<compile_context>
chip_gen: v5e
topology: v5e:2x2
jax: 0.10.0
libtpu: 0.0.40
codegen_flags: <defaults>
</compile_context>

<pallas_src>
import math

import jax
import jax.numpy as jnp
from jax.experimental import pallas as pl
from jax.experimental.pallas import tpu as pltpu

_NEG_INF = -1e30


def _round_up(x, m):
    return ((x + m - 1) // m) * m


def _layer_norm(x, gamma, beta, eps=1e-5):
    mu = jnp.mean(x, axis=-1, keepdims=True)
    var = jnp.mean((x - mu) ** 2, axis=-1, keepdims=True)
    return (x - mu) * jax.lax.rsqrt(var + eps) * gamma + beta


def _masked_layer_norm(x, gamma, beta, d_actual, d_pad, eps=1e-5):
    """LayerNorm over the last dim, ignoring zero-padded columns >= d_actual."""
    if d_actual == d_pad:
        mu = jnp.mean(x, axis=-1, keepdims=True)
        var = jnp.mean((x - mu) ** 2, axis=-1, keepdims=True)
    else:
        col = jax.lax.broadcasted_iota(jnp.int32, x.shape, x.ndim - 1)
        valid = (col < d_actual).astype(x.dtype)
        inv_d = 1.0 / float(d_actual)
        mu = jnp.sum(x * valid, axis=-1, keepdims=True) * inv_d
        var = jnp.sum(((x - mu) * valid) ** 2, axis=-1, keepdims=True) * inv_d
    return (x - mu) * jax.lax.rsqrt(var + eps) * gamma + beta


def _make_kernel(*, is_layer_norm, scale, mxu_dtype, approx_recip,
                 d, d_pad, lk, lk_pad, tk, bb, tq):
    def kernel(q_ref, k_ref, v_ref, w1_ref, b1_ref, w2_ref, b2_ref,
               g_ref, be_ref, o_ref, q_sc, m_sc, l_sc, acc_sc):
        ki = pl.program_id(2)
        last = pl.num_programs(2) - 1

        # Hoist score scale + MXU cast of Q out of the k loop: do it once per
        # q block into a small VMEM scratch.
        @pl.when(ki == 0)
        def _prep_q():
            q_sc[...] = (q_ref[...] * scale).astype(mxu_dtype)

        k = k_ref[...]          # (BB, TK, Dp) mxu dtype
        v = v_ref[...]          # (BB, TK, Dp) mxu dtype

        # scores: contract feature (last) dims, batch over BB — no K relayout.
        s = jax.lax.dot_general(
            q_sc[...], k,
            dimension_numbers=(((2,), (2,)), ((0,), (0,))),
            preferred_element_type=jnp.float32)                  # (BB, TQ, TK)

        if lk_pad != lk:
            # Only the last k tile contains padding; use a cheap (1,1,TK) row
            # iota broadcast (no full-tile iota).  The select is a no-op on
            # non-last tiles.
            key_idx = ki * tk + jax.lax.broadcasted_iota(
                jnp.int32, (1, 1, tk), 2)
            s = jnp.where(key_idx < lk, s, _NEG_INF)

        m_cur = jnp.max(s, axis=-1, keepdims=True)

        # First k step: write accumulator state directly (no init + rescale).
        @pl.when(ki == 0)
        def _first_update():
            p = jnp.exp(s - m_cur)
            l_sc[...] = jnp.sum(p, axis=-1, keepdims=True)
            acc_sc[...] = jax.lax.dot_general(
                p.astype(mxu_dtype), v,
                dimension_numbers=(((2,), (1,)), ((0,), (0,))),
                preferred_element_type=jnp.float32)              # (BB, TQ, Dp)
            m_sc[...] = m_cur

        # Subsequent k steps: online-softmax (flash) rescale + accumulate.
        @pl.when(ki > 0)
        def _update():
            m_prev = m_sc[...]
            m_new = jnp.maximum(m_prev, m_cur)
            alpha = jnp.exp(m_prev - m_new)
            p = jnp.exp(s - m_new)
            l_sc[...] = alpha * l_sc[...] + jnp.sum(p, axis=-1, keepdims=True)
            pv = jax.lax.dot_general(
                p.astype(mxu_dtype), v,
                dimension_numbers=(((2,), (1,)), ((0,), (0,))),
                preferred_element_type=jnp.float32)
            acc_sc[...] = alpha * acc_sc[...] + pv
            m_sc[...] = m_new

        @pl.when(ki == last)
        def _finalize():
            inv_l = pl.reciprocal(l_sc[...], approx=approx_recip)
            x = q_ref[...] + acc_sc[...] * inv_l                 # (BB, TQ, Dp) f32
            if is_layer_norm:
                x = _masked_layer_norm(x, g_ref[...], be_ref[...], d, d_pad)

            # FFN on a row-flattened (BB*TQ, Dp) tile: sublane-dense MXU rows.
            xr = x.reshape(bb * tq, d_pad)
            h = jnp.dot(xr.astype(mxu_dtype), w1_ref[...],
                        preferred_element_type=jnp.float32) + b1_ref[...]
            h = jnp.maximum(h, 0.0)
            ffn = jnp.dot(h.astype(mxu_dtype), w2_ref[...],
                          preferred_element_type=jnp.float32) + b2_ref[...]

            out = ffn.reshape(bb, tq, d_pad) + x
            if is_layer_norm:
                out = _masked_layer_norm(out, g_ref[...], be_ref[...], d, d_pad)
            o_ref[...] = out.astype(o_ref.dtype)

    return kernel


def _pick_bb(b, tq, num_q_tiles, row_target=256):
    """Batch elements folded per grid step: aim for >=row_target FFN rows when
    Lq is tiny, but keep >=2 parallel grid steps for megacore sharding (v7x)."""
    if num_q_tiles > 1 or b == 1:
        return 1
    target = max(1, row_target // tq)
    limit = max(1, b // 2)
    bb = 1
    for cand in range(1, min(target, limit) + 1):
        if b % cand == 0:
            bb = cand
    return bb


def _vmem_limit_bytes(bb, tq, tk, d_pad, mxu_bytes, out_bytes, w_bufs):
    """Derive the scoped-VMEM limit from the actual buffer sizes and chip."""
    f32b = 4
    est = 0
    est += 2 * bb * tq * d_pad * f32b              # Q (double-buffered)
    est += 2 * 2 * bb * tk * d_pad * mxu_bytes     # K, V (double-buffered)
    est += w_bufs * 2 * d_pad * d_pad * mxu_bytes  # W1^T, W2^T
    est += 2 * 4 * d_pad * f32b                    # b1, b2, gamma, beta
    est += 2 * bb * tq * d_pad * out_bytes         # output (double-buffered)
    est += bb * tq * (2 * f32b + d_pad * f32b + d_pad * mxu_bytes)  # scratch
    est += 4 * bb * tq * tk * f32b                 # s / p intermediates
    est += 4 * bb * tq * d_pad * f32b              # x / h / ffn intermediates
    try:
        cap = int(pltpu.get_tpu_info().vmem_capacity_bytes)
    except Exception:
        cap = 64 * 1024 * 1024                     # conservative (v7x per-TC)
    limit = int(est * 1.3) + (8 << 20)
    limit = max(limit, 32 << 20)
    return min(limit, int(cap * 0.9))


def transformer_block(Q, K, V, params, is_layer_norm=False,
                      mxu_dtype=jnp.bfloat16, approx_reciprocal=True,
                      q_tile=512, k_tile=512, out_dtype=jnp.float32):
    """Q:(B,Lq,D)  K,V:(B,Lk,D)  ->  (B,Lq,D) out_dtype."""
    B, Lq, D = Q.shape
    _, Lk, _ = K.shape
    scale = 1.0 / (math.sqrt(max(1.0, float(D))) + 1e-8)
    f32 = jnp.float32

    d_pad = _round_up(D, 128)                       # lane-dense stores
    tq = min(q_tile, _round_up(Lq, 8))              # f32 sublane tile
    lq_pad = _round_up(Lq, tq)
    num_q = lq_pad // tq
    # v7x megacore: keep >=2 parallel grid iterations when possible.
    if B == 1 and num_q == 1 and tq >= 16:
        tq = _round_up(tq // 2, 8)
        lq_pad = _round_up(Lq, tq)
        num_q = lq_pad // tq
    tk = min(k_tile, _round_up(Lk, 16))             # bf16 sublane tile
    lk_pad = _round_up(Lk, tk)
    num_k = lk_pad // tk
    bb = _pick_bb(B, tq, num_q)

    def pad_to(x, shape, dtype):
        pads = [(0, s - dd) for dd, s in zip(x.shape, shape)]
        if any(p[1] for p in pads):
            x = jnp.pad(x, pads)
        return x.astype(dtype)

    q_p = pad_to(Q, (B, lq_pad, d_pad), f32)
    k_p = pad_to(K, (B, lk_pad, d_pad), mxu_dtype)
    v_p = pad_to(V, (B, lk_pad, d_pad), mxu_dtype)
    # PyTorch Linear stores (out,in); pass (in,out) so kernel does x @ W^T.
    w1_t = pad_to(params["w1"].T, (d_pad, d_pad), mxu_dtype)
    w2_t = pad_to(params["w2"].T, (d_pad, d_pad), mxu_dtype)
    b1 = pad_to(params["b1"], (d_pad,), f32).reshape(1, d_pad)
    b2 = pad_to(params["b2"], (d_pad,), f32).reshape(1, d_pad)
    gamma = pad_to(params["gamma"], (d_pad,), f32).reshape(1, d_pad)
    beta = pad_to(params["beta"], (d_pad,), f32).reshape(1, d_pad)

    kernel = _make_kernel(is_layer_norm=is_layer_norm, scale=scale,
                          mxu_dtype=mxu_dtype, approx_recip=approx_reciprocal,
                          d=D, d_pad=d_pad, lk=Lk, lk_pad=lk_pad, tk=tk,
                          bb=bb, tq=tq)

    mxu_bytes = jnp.dtype(mxu_dtype).itemsize
    out_bytes = jnp.dtype(out_dtype).itemsize
    const2d = lambda b, qi, ki: (0, 0)

    def _call(single_buffer_weights):
        if single_buffer_weights:
            # Constant index_map -> fetched once; single-buffer to halve the
            # weights' VMEM footprint (biggest VMEM consumer at large D).
            w1_spec = pl.BlockSpec((d_pad, d_pad), const2d,
                                   pipeline_mode=pl.Buffered(1))
            w2_spec = pl.BlockSpec((d_pad, d_pad), const2d,
                                   pipeline_mode=pl.Buffered(1))
            w_bufs = 1
        else:
            w1_spec = pl.BlockSpec((d_pad, d_pad), const2d)
            w2_spec = pl.BlockSpec((d_pad, d_pad), const2d)
            w_bufs = 2

        vmem_limit = _vmem_limit_bytes(bb, tq, tk, d_pad, mxu_bytes,
                                       out_bytes, w_bufs)

        return pl.pallas_call(
            kernel,
            out_shape=jax.ShapeDtypeStruct((B, lq_pad, d_pad), out_dtype),
            grid_spec=pltpu.PrefetchScalarGridSpec(
                num_scalar_prefetch=0,
                grid=(B // bb, num_q, num_k),
                in_specs=[
                    pl.BlockSpec((bb, tq, d_pad), lambda b, qi, ki: (b, qi, 0)),  # Q
                    pl.BlockSpec((bb, tk, d_pad), lambda b, qi, ki: (b, ki, 0)),  # K
                    pl.BlockSpec((bb, tk, d_pad), lambda b, qi, ki: (b, ki, 0)),  # V
                    w1_spec,                                                      # W1^T
                    pl.BlockSpec((1, d_pad), const2d),                            # b1
                    w2_spec,                                                      # W2^T
                    pl.BlockSpec((1, d_pad), const2d),                            # b2
                    pl.BlockSpec((1, d_pad), const2d),                            # LN gamma
                    pl.BlockSpec((1, d_pad), const2d),                            # LN beta
                ],
                out_specs=pl.BlockSpec((bb, tq, d_pad),
                                       lambda b, qi, ki: (b, qi, 0)),
                scratch_shapes=[
                    pltpu.VMEM((bb, tq, d_pad), mxu_dtype),  # scaled/cast Q
                    pltpu.VMEM((bb, tq, 1), f32),            # running max
                    pltpu.VMEM((bb, tq, 1), f32),            # running denominator
                    pltpu.VMEM((bb, tq, d_pad), f32),        # P@V accumulator
                ],
            ),
            compiler_params=pltpu.CompilerParams(
                dimension_semantics=("parallel", "parallel", "arbitrary"),
                vmem_limit_bytes=vmem_limit,
            ),
        )(q_p, k_p, v_p, w1_t, b1, w2_t, b2, gamma, beta)

    try:
        out_p = _call(True)
    except Exception:
        # Fallback if this Pallas build rejects single-buffered BlockSpecs.
        out_p = _call(False)

    return out_p[:, :Lq, :D]


def init_params(key, D):
    """xavier_normal_ weights, nn.Linear default uniform biases, LN gamma/beta."""
    k1, k2, k3, k4 = jax.random.split(key, 4)
    xavier_std = (2.0 / (D + D)) ** 0.5
    bound = 1.0 / (D ** 0.5)
    return {
        "w1": xavier_std * jax.random.normal(k1, (D, D), jnp.float32),  # (out,in)
        "b1": jax.random.uniform(k2, (D,), jnp.float32, -bound, bound),
        "w2": xavier_std * jax.random.normal(k3, (D, D), jnp.float32),
        "b2": jax.random.uniform(k4, (D,), jnp.float32, -bound, bound),
        "gamma": jnp.ones((D,), jnp.float32),
        "beta": jnp.zeros((D,), jnp.float32),
    }


def _reference(Q, K, V, params, is_layer_norm=False):
    D = Q.shape[-1]
    scale = 1.0 / (math.sqrt(max(1.0, float(D))) + 1e-8)
    scores = jnp.einsum("bqd,bkd->bqk", Q, K) * scale
    p = jax.nn.softmax(scores, axis=-1)
    x = Q + jnp.einsum("bqk,bkd->bqd", p, V)
    if is_layer_norm:
        x = _layer_norm(x, params["gamma"], params["beta"])
    h = jnp.maximum(jnp.einsum("bqd,od->bqo", x, params["w1"]) + params["b1"], 0.0)
    ffn = jnp.einsum("bqd,od->bqo", h, params["w2"]) + params["b2"]
    out = ffn + x
    if is_layer_norm:
        out = _layer_norm(out, params["gamma"], params["beta"])
    return out


if __name__ == "__main__":
    B, Lq, Lk, D = 4, 8, 8, 32
    key = jax.random.PRNGKey(0)
    kq, kk, kv, kp = jax.random.split(key, 4)
    Q = jax.random.normal(kq, (B, Lq, D), jnp.float32)
    K = jax.random.normal(kk, (B, Lk, D), jnp.float32)
    V = jax.random.normal(kv, (B, Lk, D), jnp.float32)
    params = init_params(kp, D)

    ref = _reference(Q, K, V, params, is_layer_norm=False)
    ref_ln = _reference(Q, K, V, params, is_layer_norm=True)

    # Exact path (f32 MXU inputs, exact reciprocal): tight semantic check.
    out_exact = jax.block_until_ready(
        transformer_block(Q, K, V, params, is_layer_norm=False,
                          mxu_dtype=jnp.float32, approx_reciprocal=False))
    assert out_exact.shape == (B, Lq, D)
    assert jnp.allclose(out_exact, ref, atol=1e-4, rtol=1e-4), (
        float(jnp.max(jnp.abs(out_exact - ref))))

    # LayerNorm path (exact settings).
    out_ln = jax.block_until_ready(
        transformer_block(Q, K, V, params, is_layer_norm=True,
                          mxu_dtype=jnp.float32, approx_reciprocal=False))
    assert jnp.allclose(out_ln, ref_ln, atol=1e-4, rtol=1e-4), (
        float(jnp.max(jnp.abs(out_ln - ref_ln))))

    # Fast (default) path: bf16 MXU inputs + approx reciprocal — sanity check.
    out_fast = jax.block_until_ready(
        transformer_block(Q, K, V, params, is_layer_norm=False))
    rel = float(jnp.linalg.norm(out_fast - ref) / jnp.linalg.norm(ref))
    assert rel < 5e-2, rel

    print("KERNEL_OK")
</pallas_src>

<mosaic_0001>
module attributes {stable_mosaic.version = 11 : i64} {
  func.func @kernel(%arg0: i32, %arg1: i32, %arg2: i32, %arg3: memref<2x8x128xf32, #tpu.memory_space<vmem>>, %arg4: memref<2x16x128xf32, #tpu.memory_space<vmem>>, %arg5: memref<2x16x128xf32, #tpu.memory_space<vmem>>, %arg6: memref<128x128xf32, #tpu.memory_space<vmem>>, %arg7: memref<1x128xf32, #tpu.memory_space<vmem>>, %arg8: memref<128x128xf32, #tpu.memory_space<vmem>>, %arg9: memref<1x128xf32, #tpu.memory_space<vmem>>, %arg10: memref<1x128xf32, #tpu.memory_space<vmem>>, %arg11: memref<1x128xf32, #tpu.memory_space<vmem>>, %arg12: memref<2x8x128xf32, #tpu.memory_space<vmem>>, %arg13: memref<2x8x128xf32, #tpu.memory_space<vmem>>, %arg14: memref<2x8x1xf32, #tpu.memory_space<vmem>>, %arg15: memref<2x8x1xf32, #tpu.memory_space<vmem>>, %arg16: memref<2x8x128xf32, #tpu.memory_space<vmem>>) attributes {dimension_semantics = [#tpu.dimension_semantics<parallel>, #tpu.dimension_semantics<parallel>, #tpu.dimension_semantics<arbitrary>], iteration_bounds = array<i64: 2, 1, 1>, scalar_prefetch = 0 : i64, scratch_operands = 4 : i64, tpu.core_type = #tpu.core_type<tc>, window_params = [{transform_indices = @transform_0, window_bounds = array<i64: 2, 8, 128>}, {transform_indices = @transform_1, window_bounds = array<i64: 2, 16, 128>}, {transform_indices = @transform_2, window_bounds = array<i64: 2, 16, 128>}, {pipeline_mode = #tpu.pipeline_mode<synchronous>, transform_indices = @transform_3, window_bounds = array<i64: 128, 128>}, {pipeline_mode = #tpu.pipeline_mode<synchronous>, transform_indices = @transform_4, window_bounds = array<i64: 1, 128>}, {pipeline_mode = #tpu.pipeline_mode<synchronous>, transform_indices = @transform_5, window_bounds = array<i64: 128, 128>}, {pipeline_mode = #tpu.pipeline_mode<synchronous>, transform_indices = @transform_6, window_bounds = array<i64: 1, 128>}, {pipeline_mode = #tpu.pipeline_mode<synchronous>, transform_indices = @transform_7, window_bounds = array<i64: 1, 128>}, {pipeline_mode = #tpu.pipeline_mode<synchronous>, transform_indices = @transform_8, window_bounds = array<i64: 1, 128>}, {transform_indices = @transform_9, window_bounds = array<i64: 2, 8, 128>}]} {
    %c0_i32 = arith.constant 0 : i32
    %0 = arith.cmpi eq, %arg2, %c0_i32 : i32
    %1 = arith.extui %0 : i1 to i32
    %c0_i32_0 = arith.constant 0 : i32
    %2 = arith.cmpi ne, %1, %c0_i32_0 : i32
    scf.if %2 {
      %c0_17 = arith.constant 0 : index
      %c0_18 = arith.constant 0 : index
      %c0_19 = arith.constant 0 : index
      %28 = vector.load %arg3[%c0_17, %c0_18, %c0_19] : memref<2x8x128xf32, #tpu.memory_space<vmem>>, vector<2x8x128xf32>
      %cst_20 = arith.constant 0.176776692 : f32
      %29 = vector.broadcast %cst_20 : f32 to vector<2x8x128xf32>
      %30 = arith.mulf %28, %29 : vector<2x8x128xf32>
      %c0_21 = arith.constant 0 : index
      %c0_22 = arith.constant 0 : index
      %c0_23 = arith.constant 0 : index
      %31 = vector.load %arg13[%c0_21, %c0_22, %c0_23] : memref<2x8x128xf32, #tpu.memory_space<vmem>>, vector<2x8x128xf32>
      tpu.vector_store %arg13[%c0_21, %c0_22, %c0_23], %30 {strides = array<i32>} : memref<2x8x128xf32, #tpu.memory_space<vmem>>, vector<2x8x128xf32>,
    } else {
    }
    %c0 = arith.constant 0 : index
    %c0_1 = arith.constant 0 : index
    %c0_2 = arith.constant 0 : index
    %3 = vector.load %arg4[%c0, %c0_1, %c0_2] : memref<2x16x128xf32, #tpu.memory_space<vmem>>, vector<2x16x128xf32>
    %c0_3 = arith.constant 0 : index
    %c0_4 = arith.constant 0 : index
    %c0_5 = arith.constant 0 : index
    %4 = vector.load %arg5[%c0_3, %c0_4, %c0_5] : memref<2x16x128xf32, #tpu.memory_space<vmem>>, vector<2x16x128xf32>
    %c0_6 = arith.constant 0 : index
    %c0_7 = arith.constant 0 : index
    %c0_8 = arith.constant 0 : index
    %5 = vector.load %arg13[%c0_6, %c0_7, %c0_8] : memref<2x8x128xf32, #tpu.memory_space<vmem>>, vector<2x8x128xf32>
    %cst = arith.constant dense<0.000000e+00> : vector<2x8x16xf32>
    %6 = tpu.matmul %5, %3, %cst {dimension_numbers = #tpu.dot_dimension_numbers<[2], [2], [1], [1], [0, 0, 0, 1, 1, 1], [0], [0]>} : vector<2x8x128xf32>, vector<2x16x128xf32>, vector<2x8x16xf32> -> vector<2x8x16xf32>
    %c16_i32 = arith.constant 16 : i32
    %7 = arith.muli %arg2, %c16_i32 : i32
    %8 = tpu.iota {dimensions = array<i32: 2>} : vector<1x1x16xi32>
    %9 = vector.broadcast %7 : i32 to vector<1x1x16xi32>
    %10 = arith.addi %9, %8 : vector<1x1x16xi32>
    %c8_i32 = arith.constant 8 : i32
    %11 = vector.broadcast %c8_i32 : i32 to vector<1x1x16xi32>
    %12 = arith.cmpi slt, %10, %11 : vector<1x1x16xi32>
    %cst_9 = arith.constant -1.000000e+30 : f32
    %13 = vector.shape_cast %12 : vector<1x1x16xi1> to vector<1x1x16xi1>
    %14 = vector.broadcast %13 : vector<1x1x16xi1> to vector<2x8x16xi1>
    %15 = vector.broadcast %cst_9 : f32 to vector<2x8x16xf32>
    %16 = arith.select %14, %6, %15 : vector<2x8x16xi1>, vector<2x8x16xf32>
    %cst_10 = arith.constant dense<0xFF800000> : vector<2x8xf32>
    %17 = vector.multi_reduction <maximumf>, %16, %cst_10 [2] : vector<2x8x16xf32> to vector<2x8xf32>
    %18 = vector.shape_cast %17 : vector<2x8xf32> to vector<2x8x1xf32>
    %c0_i32_11 = arith.constant 0 : i32
    %19 = arith.cmpi eq, %arg2, %c0_i32_11 : i32
    %20 = arith.extui %19 : i1 to i32
    %c0_i32_12 = arith.constant 0 : i32
    %21 = arith.cmpi ne, %20, %c0_i32_12 : i32
    scf.if %21 {
      %28 = vector.broadcast %18 : vector<2x8x1xf32> to vector<2x8x16xf32>
      %29 = arith.subf %16, %28 : vector<2x8x16xf32>
      %30 = math.exp %29 : vector<2x8x16xf32>
      %cst_17 = arith.constant dense<0.000000e+00> : vector<2x8xf32>
      %31 = vector.multi_reduction <add>, %30, %cst_17 [2] : vector<2x8x16xf32> to vector<2x8xf32>
      %32 = vector.shape_cast %31 : vector<2x8xf32> to vector<2x8x1xf32>
      %c0_18 = arith.constant 0 : index
      %c0_19 = arith.constant 0 : index
      %c0_20 = arith.constant 0 : index
      %33 = vector.load %arg15[%c0_18, %c0_19, %c0_20] : memref<2x8x1xf32, #tpu.memory_space<vmem>>, vector<2x8x1xf32>
      tpu.vector_store %arg15[%c0_18, %c0_19, %c0_20], %32 {strides = array<i32>} : memref<2x8x1xf32, #tpu.memory_space<vmem>>, vector<2x8x1xf32>,
      %cst_21 = arith.constant dense<0.000000e+00> : vector<2x8x128xf32>
      %34 = tpu.matmul %30, %4, %cst_21 {dimension_numbers = #tpu.dot_dimension_numbers<[2], [1], [1], [2], [0, 0, 0, 1, 1, 2], [0], [0]>} : vector<2x8x16xf32>, vector<2x16x128xf32>, vector<2x8x128xf32> -> vector<2x8x128xf32>
      %c0_22 = arith.constant 0 : index
      %c0_23 = arith.constant 0 : index
      %c0_24 = arith.constant 0 : index
      %35 = vector.load %arg16[%c0_22, %c0_23, %c0_24] : memref<2x8x128xf32, #tpu.memory_space<vmem>>, vector<2x8x128xf32>
      tpu.vector_store %arg16[%c0_22, %c0_23, %c0_24], %34 {strides = array<i32>} : memref<2x8x128xf32, #tpu.memory_space<vmem>>, vector<2x8x128xf32>,
      %c0_25 = arith.constant 0 : index
      %c0_26 = arith.constant 0 : index
      %c0_27 = arith.constant 0 : index
      %36 = vector.load %arg14[%c0_25, %c0_26, %c0_27] : memref<2x8x1xf32, #tpu.memory_space<vmem>>, vector<2x8x1xf32>
      tpu.vector_store %arg14[%c0_25, %c0_26, %c0_27], %18 {strides = array<i32>} : memref<2x8x1xf32, #tpu.memory_space<vmem>>, vector<2x8x1xf32>,
    } else {
    }
    %c0_i32_13 = arith.constant 0 : i32
    %22 = arith.cmpi sgt, %arg2, %c0_i32_13 : i32
    %23 = arith.extui %22 : i1 to i32
    %c0_i32_14 = arith.constant 0 : i32
    %24 = arith.cmpi ne, %23, %c0_i32_14 : i32
    scf.if %24 {
      %c0_17 = arith.constant 0 : index
      %c0_18 = arith.constant 0 : index
      %c0_19 = arith.constant 0 : index
      %28 = vector.load %arg14[%c0_17, %c0_18, %c0_19] : memref<2x8x1xf32, #tpu.memory_space<vmem>>, vector<2x8x1xf32>
      %29 = arith.maximumf %28, %18 : vector<2x8x1xf32>
      %30 = arith.subf %28, %29 : vector<2x8x1xf32>
      %31 = math.exp %30 : vector<2x8x1xf32>
      %32 = vector.broadcast %29 : vector<2x8x1xf32> to vector<2x8x16xf32>
      %33 = arith.subf %16, %32 : vector<2x8x16xf32>
      %34 = math.exp %33 : vector<2x8x16xf32>
      %c0_20 = arith.constant 0 : index
      %c0_21 = arith.constant 0 : index
      %c0_22 = arith.constant 0 : index
      %35 = vector.load %arg15[%c0_20, %c0_21, %c0_22] : memref<2x8x1xf32, #tpu.memory_space<vmem>>, vector<2x8x1xf32>
      %36 = arith.mulf %31, %35 : vector<2x8x1xf32>
      %cst_23 = arith.constant dense<0.000000e+00> : vector<2x8xf32>
      %37 = vector.multi_reduction <add>, %34, %cst_23 [2] : vector<2x8x16xf32> to vector<2x8xf32>
      %38 = vector.shape_cast %37 : vector<2x8xf32> to vector<2x8x1xf32>
      %39 = arith.addf %36, %38 : vector<2x8x1xf32>
      %c0_24 = arith.constant 0 : index
      %c0_25 = arith.constant 0 : index
      %c0_26 = arith.constant 0 : index
      %40 = vector.load %arg15[%c0_24, %c0_25, %c0_26] : memref<2x8x1xf32, #tpu.memory_space<vmem>>, vector<2x8x1xf32>
      tpu.vector_store %arg15[%c0_24, %c0_25, %c0_26], %39 {strides = array<i32>} : memref<2x8x1xf32, #tpu.memory_space<vmem>>, vector<2x8x1xf32>,
      %cst_27 = arith.constant dense<0.000000e+00> : vector<2x8x128xf32>
      %41 = tpu.matmul %34, %4, %cst_27 {dimension_numbers = #tpu.dot_dimension_numbers<[2], [1], [1], [2], [0, 0, 0, 1, 1, 2], [0], [0]>} : vector<2x8x16xf32>, vector<2x16x128xf32>, vector<2x8x128xf32> -> vector<2x8x128xf32>
      %c0_28 = arith.constant 0 : index
      %c0_29 = arith.constant 0 : index
      %c0_30 = arith.constant 0 : index
      %42 = vector.load %arg16[%c0_28, %c0_29, %c0_30] : memref<2x8x128xf32, #tpu.memory_space<vmem>>, vector<2x8x128xf32>
      %43 = vector.broadcast %31 : vector<2x8x1xf32> to vector<2x8x128xf32>
      %44 = arith.mulf %43, %42 : vector<2x8x128xf32>
      %45 = arith.addf %44, %41 : vector<2x8x128xf32>
      %c0_31 = arith.constant 0 : index
      %c0_32 = arith.constant 0 : index
      %c0_33 = arith.constant 0 : index
      %46 = vector.load %arg16[%c0_31, %c0_32, %c0_33] : memref<2x8x128xf32, #tpu.memory_space<vmem>>, vector<2x8x128xf32>
      tpu.vector_store %arg16[%c0_31, %c0_32, %c0_33], %45 {strides = array<i32>} : memref<2x8x128xf32, #tpu.memory_space<vmem>>, vector<2x8x128xf32>,
      %c0_34 = arith.constant 0 : index
      %c0_35 = arith.constant 0 : index
      %c0_36 = arith.constant 0 : index
      %47 = vector.load %arg14[%c0_34, %c0_35, %c0_36] : memref<2x8x1xf32, #tpu.memory_space<vmem>>, vector<2x8x1xf32>
      tpu.vector_store %arg14[%c0_34, %c0_35, %c0_36], %29 {strides = array<i32>} : memref<2x8x1xf32, #tpu.memory_space<vmem>>, vector<2x8x1xf32>,
    } else {
    }
    %c0_i32_15 = arith.constant 0 : i32
    %25 = arith.cmpi eq, %arg2, %c0_i32_15 : i32
    %26 = arith.extui %25 : i1 to i32
    %c0_i32_16 = arith.constant 0 : i32
    %27 = arith.cmpi ne, %26, %c0_i32_16 : i32
    scf.if %27 {
      %c0_17 = arith.constant 0 : index
      %c0_18 = arith.constant 0 : index
      %c0_19 = arith.constant 0 : index
      %28 = vector.load %arg15[%c0_17, %c0_18, %c0_19] : memref<2x8x1xf32, #tpu.memory_space<vmem>>, vector<2x8x1xf32>
      %29 = tpu.reciprocal %28 : vector<2x8x1xf32> -> vector<2x8x1xf32>
      %c0_20 = arith.constant 0 : index
      %c0_21 = arith.constant 0 : index
      %c0_22 = arith.constant 0 : index
      %30 = vector.load %arg3[%c0_20, %c0_21, %c0_22] : memref<2x8x128xf32, #tpu.memory_space<vmem>>, vector<2x8x128xf32>
      %c0_23 = arith.constant 0 : index
      %c0_24 = arith.constant 0 : index
      %c0_25 = arith.constant 0 : index
      %31 = vector.load %arg16[%c0_23, %c0_24, %c0_25] : memref<2x8x128xf32, #tpu.memory_space<vmem>>, vector<2x8x128xf32>
      %32 = vector.broadcast %29 : vector<2x8x1xf32> to vector<2x8x128xf32>
      %33 = arith.mulf %31, %32 : vector<2x8x128xf32>
      %34 = arith.addf %30, %33 : vector<2x8x128xf32>
      %35 = vector.shape_cast %34 : vector<2x8x128xf32> to vector<16x128xf32>
      %c0_26 = arith.constant 0 : index
      %c0_27 = arith.constant 0 : index
      %36 = vector.load %arg6[%c0_26, %c0_27] : memref<128x128xf32, #tpu.memory_space<vmem>>, vector<128x128xf32>
      %cst_28 = arith.constant dense<0.000000e+00> : vector<16x128xf32>
      %37 = tpu.matmul %35, %36, %cst_28 {dimension_numbers = #tpu.dot_dimension_numbers<[1], [0], [0], [1], [0, 0, 1, 1], [], []>} : vector<16x128xf32>, vector<128x128xf32>, vector<16x128xf32> -> vector<16x128xf32>
      %c0_29 = arith.constant 0 : index
      %c0_30 = arith.constant 0 : index
      %38 = vector.load %arg7[%c0_29, %c0_30] : memref<1x128xf32, #tpu.memory_space<vmem>>, vector<1x128xf32>
      %39 = vector.broadcast %38 : vector<1x128xf32> to vector<16x128xf32>
      %40 = arith.addf %37, %39 : vector<16x128xf32>
      %cst_31 = arith.constant 0.000000e+00 : f32
      %41 = vector.broadcast %cst_31 : f32 to vector<16x128xf32>
      %42 = arith.maximumf %40, %41 : vector<16x128xf32>
      %c0_32 = arith.constant 0 : index
      %c0_33 = arith.constant 0 : index
      %43 = vector.load %arg8[%c0_32, %c0_33] : memref<128x128xf32, #tpu.memory_space<vmem>>, vector<128x128xf32>
      %cst_34 = arith.constant dense<0.000000e+00> : vector<16x128xf32>
      %44 = tpu.matmul %42, %43, %cst_34 {dimension_numbers = #tpu.dot_dimension_numbers<[1], [0], [0], [1], [0, 0, 1, 1], [], []>} : vector<16x128xf32>, vector<128x128xf32>, vector<16x128xf32> -> vector<16x128xf32>
      %c0_35 = arith.constant 0 : index
      %c0_36 = arith.constant 0 : index
      %45 = vector.load %arg9[%c0_35, %c0_36] : memref<1x128xf32, #tpu.memory_space<vmem>>, vector<1x128xf32>
      %46 = vector.broadcast %45 : vector<1x128xf32> to vector<16x128xf32>
      %47 = arith.addf %44, %46 : vector<16x128xf32>
      %48 = vector.shape_cast %47 : vector<16x128xf32> to vector<2x8x128xf32>
      %49 = arith.addf %48, %34 : vector<2x8x128xf32>
      %c0_37 = arith.constant 0 : index
      %c0_38 = arith.constant 0 : index
      %c0_39 = arith.constant 0 : index
      %50 = vector.load %arg12[%c0_37, %c0_38, %c0_39] : memref<2x8x128xf32, #tpu.memory_space<vmem>>, vector<2x8x128xf32>
      tpu.vector_store %arg12[%c0_37, %c0_38, %c0_39], %49 {strides = array<i32>} : memref<2x8x128xf32, #tpu.memory_space<vmem>>, vector<2x8x128xf32>,
    } else {
    }
    return
  }
  func.func @transform_0(%arg0: i32, %arg1: i32, %arg2: i32) -> (i32, i32, i32) {
    %c0_i32 = arith.constant 0 : i32
    %c0_i32_0 = arith.constant 0 : i32
    return %arg0, %arg1, %c0_i32 : i32, i32, i32
  }
  func.func @transform_1(%arg0: i32, %arg1: i32, %arg2: i32) -> (i32, i32, i32) {
    %c0_i32 = arith.constant 0 : i32
    %c0_i32_0 = arith.constant 0 : i32
    return %arg0, %arg2, %c0_i32 : i32, i32, i32
  }
  func.func @transform_2(%arg0: i32, %arg1: i32, %arg2: i32) -> (i32, i32, i32) {
    %c0_i32 = arith.constant 0 : i32
    %c0_i32_0 = arith.constant 0 : i32
    return %arg0, %arg2, %c0_i32 : i32, i32, i32
  }
  func.func @transform_3(%arg0: i32, %arg1: i32, %arg2: i32) -> (i32, i32) {
    %c0_i32 = arith.constant 0 : i32
    %c0_i32_0 = arith.constant 0 : i32
    %c0_i32_1 = arith.constant 0 : i32
    return %c0_i32, %c0_i32_0 : i32, i32
  }
  func.func @transform_4(%arg0: i32, %arg1: i32, %arg2: i32) -> (i32, i32) {
    %c0_i32 = arith.constant 0 : i32
    %c0_i32_0 = arith.constant 0 : i32
    %c0_i32_1 = arith.constant 0 : i32
    return %c0_i32, %c0_i32_0 : i32, i32
  }
  func.func @transform_5(%arg0: i32, %arg1: i32, %arg2: i32) -> (i32, i32) {
    %c0_i32 = arith.constant 0 : i32
    %c0_i32_0 = arith.constant 0 : i32
    %c0_i32_1 = arith.constant 0 : i32
    return %c0_i32, %c0_i32_0 : i32, i32
  }
  func.func @transform_6(%arg0: i32, %arg1: i32, %arg2: i32) -> (i32, i32) {
    %c0_i32 = arith.constant 0 : i32
    %c0_i32_0 = arith.constant 0 : i32
    %c0_i32_1 = arith.constant 0 : i32
    return %c0_i32, %c0_i32_0 : i32, i32
  }
  func.func @transform_7(%arg0: i32, %arg1: i32, %arg2: i32) -> (i32, i32) {
    %c0_i32 = arith.constant 0 : i32
    %c0_i32_0 = arith.constant 0 : i32
    %c0_i32_1 = arith.constant 0 : i32
    return %c0_i32, %c0_i32_0 : i32, i32
  }
  func.func @transform_8(%arg0: i32, %arg1: i32, %arg2: i32) -> (i32, i32) {
    %c0_i32 = arith.constant 0 : i32
    %c0_i32_0 = arith.constant 0 : i32
    %c0_i32_1 = arith.constant 0 : i32
    return %c0_i32, %c0_i32_0 : i32, i32
  }
  func.func @transform_9(%arg0: i32, %arg1: i32, %arg2: i32) -> (i32, i32, i32) {
    %c0_i32 = arith.constant 0 : i32
    %c0_i32_0 = arith.constant 0 : i32
    return %arg0, %arg1, %c0_i32 : i32, i32, i32
  }
}

module attributes {stable_mosaic.version = 11 : i64} {
  func.func @kernel(%arg0: i32, %arg1: i32, %arg2: i32, %arg3: memref<2x8x128xf32, #tpu.memory_space<vmem>>, %arg4: memref<2x16x128xf32, #tpu.memory_space<vmem>>, %arg5: memref<2x16x128xf32, #tpu.memory_space<vmem>>, %arg6: memref<128x128xf32, #tpu.memory_space<vmem>>, %arg7: memref<1x128xf32, #tpu.memory_space<vmem>>, %arg8: memref<128x128xf32, #tpu.memory_space<vmem>>, %arg9: memref<1x128xf32, #tpu.memory_space<vmem>>, %arg10: memref<1x128xf32, #tpu.memory_space<vmem>>, %arg11: memref<1x128xf32, #tpu.memory_space<vmem>>, %arg12: memref<2x8x128xf32, #tpu.memory_space<vmem>>, %arg13: memref<2x8x128xf32, #tpu.memory_space<vmem>>, %arg14: memref<2x8x1xf32, #tpu.memory_space<vmem>>, %arg15: memref<2x8x1xf32, #tpu.memory_space<vmem>>, %arg16: memref<2x8x128xf32, #tpu.memory_space<vmem>>) attributes {dimension_semantics = [#tpu.dimension_semantics<parallel>, #tpu.dimension_semantics<parallel>, #tpu.dimension_semantics<arbitrary>], iteration_bounds = array<i64: 2, 1, 1>, scalar_prefetch = 0 : i64, scratch_operands = 4 : i64, tpu.core_type = #tpu.core_type<tc>, window_params = [{transform_indices = @transform_0, window_bounds = array<i64: 2, 8, 128>}, {transform_indices = @transform_1, window_bounds = array<i64: 2, 16, 128>}, {transform_indices = @transform_2, window_bounds = array<i64: 2, 16, 128>}, {pipeline_mode = #tpu.pipeline_mode<synchronous>, transform_indices = @transform_3, window_bounds = array<i64: 128, 128>}, {pipeline_mode = #tpu.pipeline_mode<synchronous>, transform_indices = @transform_4, window_bounds = array<i64: 1, 128>}, {pipeline_mode = #tpu.pipeline_mode<synchronous>, transform_indices = @transform_5, window_bounds = array<i64: 128, 128>}, {pipeline_mode = #tpu.pipeline_mode<synchronous>, transform_indices = @transform_6, window_bounds = array<i64: 1, 128>}, {pipeline_mode = #tpu.pipeline_mode<synchronous>, transform_indices = @transform_7, window_bounds = array<i64: 1, 128>}, {pipeline_mode = #tpu.pipeline_mode<synchronous>, transform_indices = @transform_8, window_bounds = array<i64: 1, 128>}, {transform_indices = @transform_9, window_bounds = array<i64: 2, 8, 128>}]} {
    %c0_i32 = arith.constant 0 : i32
    %0 = arith.cmpi eq, %arg2, %c0_i32 : i32
    %1 = arith.extui %0 : i1 to i32
    %c0_i32_0 = arith.constant 0 : i32
    %2 = arith.cmpi ne, %1, %c0_i32_0 : i32
    scf.if %2 {
      %c0_17 = arith.constant 0 : index
      %c0_18 = arith.constant 0 : index
      %c0_19 = arith.constant 0 : index
      %28 = vector.load %arg3[%c0_17, %c0_18, %c0_19] : memref<2x8x128xf32, #tpu.memory_space<vmem>>, vector<2x8x128xf32>
      %cst_20 = arith.constant 0.176776692 : f32
      %29 = vector.broadcast %cst_20 : f32 to vector<2x8x128xf32>
      %30 = arith.mulf %28, %29 : vector<2x8x128xf32>
      %c0_21 = arith.constant 0 : index
      %c0_22 = arith.constant 0 : index
      %c0_23 = arith.constant 0 : index
      %31 = vector.load %arg13[%c0_21, %c0_22, %c0_23] : memref<2x8x128xf32, #tpu.memory_space<vmem>>, vector<2x8x128xf32>
      tpu.vector_store %arg13[%c0_21, %c0_22, %c0_23], %30 {strides = array<i32>} : memref<2x8x128xf32, #tpu.memory_space<vmem>>, vector<2x8x128xf32>,
    } else {
    }
    %c0 = arith.constant 0 : index
    %c0_1 = arith.constant 0 : index
    %c0_2 = arith.constant 0 : index
    %3 = vector.load %arg4[%c0, %c0_1, %c0_2] : memref<2x16x128xf32, #tpu.memory_space<vmem>>, vector<2x16x128xf32>
    %c0_3 = arith.constant 0 : index
    %c0_4 = arith.constant 0 : index
    %c0_5 = arith.constant 0 : index
    %4 = vector.load %arg5[%c0_3, %c0_4, %c0_5] : memref<2x16x128xf32, #tpu.memory_space<vmem>>, vector<2x16x128xf32>
    %c0_6 = arith.constant 0 : index
    %c0_7 = arith.constant 0 : index
    %c0_8 = arith.constant 0 : index
    %5 = vector.load %arg13[%c0_6, %c0_7, %c0_8] : memref<2x8x128xf32, #tpu.memory_space<vmem>>, vector<2x8x128xf32>
    %cst = arith.constant dense<0.000000e+00> : vector<2x8x16xf32>
    %6 = tpu.matmul %5, %3, %cst {dimension_numbers = #tpu.dot_dimension_numbers<[2], [2], [1], [1], [0, 0, 0, 1, 1, 1], [0], [0]>} : vector<2x8x128xf32>, vector<2x16x128xf32>, vector<2x8x16xf32> -> vector<2x8x16xf32>
    %c16_i32 = arith.constant 16 : i32
    %7 = arith.muli %arg2, %c16_i32 : i32
    %8 = tpu.iota {dimensions = array<i32: 2>} : vector<1x1x16xi32>
    %9 = vector.broadcast %7 : i32 to vector<1x1x16xi32>
    %10 = arith.addi %9, %8 : vector<1x1x16xi32>
    %c8_i32 = arith.constant 8 : i32
    %11 = vector.broadcast %c8_i32 : i32 to vector<1x1x16xi32>
    %12 = arith.cmpi slt, %10, %11 : vector<1x1x16xi32>
    %cst_9 = arith.constant -1.000000e+30 : f32
    %13 = vector.shape_cast %12 : vector<1x1x16xi1> to vector<1x1x16xi1>
    %14 = vector.broadcast %13 : vector<1x1x16xi1> to vector<2x8x16xi1>
    %15 = vector.broadcast %cst_9 : f32 to vector<2x8x16xf32>
    %16 = arith.select %14, %6, %15 : vector<2x8x16xi1>, vector<2x8x16xf32>
    %cst_10 = arith.constant dense<0xFF800000> : vector<2x8xf32>
    %17 = vector.multi_reduction <maximumf>, %16, %cst_10 [2] : vector<2x8x16xf32> to vector<2x8xf32>
    %18 = vector.shape_cast %17 : vector<2x8xf32> to vector<2x8x1xf32>
    %c0_i32_11 = arith.constant 0 : i32
    %19 = arith.cmpi eq, %arg2, %c0_i32_11 : i32
    %20 = arith.extui %19 : i1 to i32
    %c0_i32_12 = arith.constant 0 : i32
    %21 = arith.cmpi ne, %20, %c0_i32_12 : i32
    scf.if %21 {
      %28 = vector.broadcast %18 : vector<2x8x1xf32> to vector<2x8x16xf32>
      %29 = arith.subf %16, %28 : vector<2x8x16xf32>
      %30 = math.exp %29 : vector<2x8x16xf32>
      %cst_17 = arith.constant dense<0.000000e+00> : vector<2x8xf32>
      %31 = vector.multi_reduction <add>, %30, %cst_17 [2] : vector<2x8x16xf32> to vector<2x8xf32>
      %32 = vector.shape_cast %31 : vector<2x8xf32> to vector<2x8x1xf32>
      %c0_18 = arith.constant 0 : index
      %c0_19 = arith.constant 0 : index
      %c0_20 = arith.constant 0 : index
      %33 = vector.load %arg15[%c0_18, %c0_19, %c0_20] : memref<2x8x1xf32, #tpu.memory_space<vmem>>, vector<2x8x1xf32>
      tpu.vector_store %arg15[%c0_18, %c0_19, %c0_20], %32 {strides = array<i32>} : memref<2x8x1xf32, #tpu.memory_space<vmem>>, vector<2x8x1xf32>,
      %cst_21 = arith.constant dense<0.000000e+00> : vector<2x8x128xf32>
      %34 = tpu.matmul %30, %4, %cst_21 {dimension_numbers = #tpu.dot_dimension_numbers<[2], [1], [1], [2], [0, 0, 0, 1, 1, 2], [0], [0]>} : vector<2x8x16xf32>, vector<2x16x128xf32>, vector<2x8x128xf32> -> vector<2x8x128xf32>
      %c0_22 = arith.constant 0 : index
      %c0_23 = arith.constant 0 : index
      %c0_24 = arith.constant 0 : index
      %35 = vector.load %arg16[%c0_22, %c0_23, %c0_24] : memref<2x8x128xf32, #tpu.memory_space<vmem>>, vector<2x8x128xf32>
      tpu.vector_store %arg16[%c0_22, %c0_23, %c0_24], %34 {strides = array<i32>} : memref<2x8x128xf32, #tpu.memory_space<vmem>>, vector<2x8x128xf32>,
      %c0_25 = arith.constant 0 : index
      %c0_26 = arith.constant 0 : index
      %c0_27 = arith.constant 0 : index
      %36 = vector.load %arg14[%c0_25, %c0_26, %c0_27] : memref<2x8x1xf32, #tpu.memory_space<vmem>>, vector<2x8x1xf32>
      tpu.vector_store %arg14[%c0_25, %c0_26, %c0_27], %18 {strides = array<i32>} : memref<2x8x1xf32, #tpu.memory_space<vmem>>, vector<2x8x1xf32>,
    } else {
    }
    %c0_i32_13 = arith.constant 0 : i32
    %22 = arith.cmpi sgt, %arg2, %c0_i32_13 : i32
    %23 = arith.extui %22 : i1 to i32
    %c0_i32_14 = arith.constant 0 : i32
    %24 = arith.cmpi ne, %23, %c0_i32_14 : i32
    scf.if %24 {
      %c0_17 = arith.constant 0 : index
      %c0_18 = arith.constant 0 : index
      %c0_19 = arith.constant 0 : index
      %28 = vector.load %arg14[%c0_17, %c0_18, %c0_19] : memref<2x8x1xf32, #tpu.memory_space<vmem>>, vector<2x8x1xf32>
      %29 = arith.maximumf %28, %18 : vector<2x8x1xf32>
      %30 = arith.subf %28, %29 : vector<2x8x1xf32>
      %31 = math.exp %30 : vector<2x8x1xf32>
      %32 = vector.broadcast %29 : vector<2x8x1xf32> to vector<2x8x16xf32>
      %33 = arith.subf %16, %32 : vector<2x8x16xf32>
      %34 = math.exp %33 : vector<2x8x16xf32>
      %c0_20 = arith.constant 0 : index
      %c0_21 = arith.constant 0 : index
      %c0_22 = arith.constant 0 : index
      %35 = vector.load %arg15[%c0_20, %c0_21, %c0_22] : memref<2x8x1xf32, #tpu.memory_space<vmem>>, vector<2x8x1xf32>
      %36 = arith.mulf %31, %35 : vector<2x8x1xf32>
      %cst_23 = arith.constant dense<0.000000e+00> : vector<2x8xf32>
      %37 = vector.multi_reduction <add>, %34, %cst_23 [2] : vector<2x8x16xf32> to vector<2x8xf32>
      %38 = vector.shape_cast %37 : vector<2x8xf32> to vector<2x8x1xf32>
      %39 = arith.addf %36, %38 : vector<2x8x1xf32>
      %c0_24 = arith.constant 0 : index
      %c0_25 = arith.constant 0 : index
      %c0_26 = arith.constant 0 : index
      %40 = vector.load %arg15[%c0_24, %c0_25, %c0_26] : memref<2x8x1xf32, #tpu.memory_space<vmem>>, vector<2x8x1xf32>
      tpu.vector_store %arg15[%c0_24, %c0_25, %c0_26], %39 {strides = array<i32>} : memref<2x8x1xf32, #tpu.memory_space<vmem>>, vector<2x8x1xf32>,
      %cst_27 = arith.constant dense<0.000000e+00> : vector<2x8x128xf32>
      %41 = tpu.matmul %34, %4, %cst_27 {dimension_numbers = #tpu.dot_dimension_numbers<[2], [1], [1], [2], [0, 0, 0, 1, 1, 2], [0], [0]>} : vector<2x8x16xf32>, vector<2x16x128xf32>, vector<2x8x128xf32> -> vector<2x8x128xf32>
      %c0_28 = arith.constant 0 : index
      %c0_29 = arith.constant 0 : index
      %c0_30 = arith.constant 0 : index
      %42 = vector.load %arg16[%c0_28, %c0_29, %c0_30] : memref<2x8x128xf32, #tpu.memory_space<vmem>>, vector<2x8x128xf32>
      %43 = vector.broadcast %31 : vector<2x8x1xf32> to vector<2x8x128xf32>
      %44 = arith.mulf %43, %42 : vector<2x8x128xf32>
      %45 = arith.addf %44, %41 : vector<2x8x128xf32>
      %c0_31 = arith.constant 0 : index
      %c0_32 = arith.constant 0 : index
      %c0_33 = arith.constant 0 : index
      %46 = vector.load %arg16[%c0_31, %c0_32, %c0_33] : memref<2x8x128xf32, #tpu.memory_space<vmem>>, vector<2x8x128xf32>
      tpu.vector_store %arg16[%c0_31, %c0_32, %c0_33], %45 {strides = array<i32>} : memref<2x8x128xf32, #tpu.memory_space<vmem>>, vector<2x8x128xf32>,
      %c0_34 = arith.constant 0 : index
      %c0_35 = arith.constant 0 : index
      %c0_36 = arith.constant 0 : index
      %47 = vector.load %arg14[%c0_34, %c0_35, %c0_36] : memref<2x8x1xf32, #tpu.memory_space<vmem>>, vector<2x8x1xf32>
      tpu.vector_store %arg14[%c0_34, %c0_35, %c0_36], %29 {strides = array<i32>} : memref<2x8x1xf32, #tpu.memory_space<vmem>>, vector<2x8x1xf32>,
    } else {
    }
    %c0_i32_15 = arith.constant 0 : i32
    %25 = arith.cmpi eq, %arg2, %c0_i32_15 : i32
    %26 = arith.extui %25 : i1 to i32
    %c0_i32_16 = arith.constant 0 : i32
    %27 = arith.cmpi ne, %26, %c0_i32_16 : i32
    scf.if %27 {
      %c0_17 = arith.constant 0 : index
      %c0_18 = arith.constant 0 : index
      %c0_19 = arith.constant 0 : index
      %28 = vector.load %arg15[%c0_17, %c0_18, %c0_19] : memref<2x8x1xf32, #tpu.memory_space<vmem>>, vector<2x8x1xf32>
      %29 = tpu.reciprocal %28 : vector<2x8x1xf32> -> vector<2x8x1xf32>
      %c0_20 = arith.constant 0 : index
      %c0_21 = arith.constant 0 : index
      %c0_22 = arith.constant 0 : index
      %30 = vector.load %arg3[%c0_20, %c0_21, %c0_22] : memref<2x8x128xf32, #tpu.memory_space<vmem>>, vector<2x8x128xf32>
      %c0_23 = arith.constant 0 : index
      %c0_24 = arith.constant 0 : index
      %c0_25 = arith.constant 0 : index
      %31 = vector.load %arg16[%c0_23, %c0_24, %c0_25] : memref<2x8x128xf32, #tpu.memory_space<vmem>>, vector<2x8x128xf32>
      %32 = vector.broadcast %29 : vector<2x8x1xf32> to vector<2x8x128xf32>
      %33 = arith.mulf %31, %32 : vector<2x8x128xf32>
      %34 = arith.addf %30, %33 : vector<2x8x128xf32>
      %35 = vector.shape_cast %34 : vector<2x8x128xf32> to vector<16x128xf32>
      %c0_26 = arith.constant 0 : index
      %c0_27 = arith.constant 0 : index
      %36 = vector.load %arg6[%c0_26, %c0_27] : memref<128x128xf32, #tpu.memory_space<vmem>>, vector<128x128xf32>
      %cst_28 = arith.constant dense<0.000000e+00> : vector<16x128xf32>
      %37 = tpu.matmul %35, %36, %cst_28 {dimension_numbers = #tpu.dot_dimension_numbers<[1], [0], [0], [1], [0, 0, 1, 1], [], []>} : vector<16x128xf32>, vector<128x128xf32>, vector<16x128xf32> -> vector<16x128xf32>
      %c0_29 = arith.constant 0 : index
      %c0_30 = arith.constant 0 : index
      %38 = vector.load %arg7[%c0_29, %c0_30] : memref<1x128xf32, #tpu.memory_space<vmem>>, vector<1x128xf32>
      %39 = vector.broadcast %38 : vector<1x128xf32> to vector<16x128xf32>
      %40 = arith.addf %37, %39 : vector<16x128xf32>
      %cst_31 = arith.constant 0.000000e+00 : f32
      %41 = vector.broadcast %cst_31 : f32 to vector<16x128xf32>
      %42 = arith.maximumf %40, %41 : vector<16x128xf32>
      %c0_32 = arith.constant 0 : index
      %c0_33 = arith.constant 0 : index
      %43 = vector.load %arg8[%c0_32, %c0_33] : memref<128x128xf32, #tpu.memory_space<vmem>>, vector<128x128xf32>
      %cst_34 = arith.constant dense<0.000000e+00> : vector<16x128xf32>
      %44 = tpu.matmul %42, %43, %cst_34 {dimension_numbers = #tpu.dot_dimension_numbers<[1], [0], [0], [1], [0, 0, 1, 1], [], []>} : vector<16x128xf32>, vector<128x128xf32>, vector<16x128xf32> -> vector<16x128xf32>
      %c0_35 = arith.constant 0 : index
      %c0_36 = arith.constant 0 : index
      %45 = vector.load %arg9[%c0_35, %c0_36] : memref<1x128xf32, #tpu.memory_space<vmem>>, vector<1x128xf32>
      %46 = vector.broadcast %45 : vector<1x128xf32> to vector<16x128xf32>
      %47 = arith.addf %44, %46 : vector<16x128xf32>
      %48 = vector.shape_cast %47 : vector<16x128xf32> to vector<2x8x128xf32>
      %49 = arith.addf %48, %34 : vector<2x8x128xf32>
      %c0_37 = arith.constant 0 : index
      %c0_38 = arith.constant 0 : index
      %c0_39 = arith.constant 0 : index
      %50 = vector.load %arg12[%c0_37, %c0_38, %c0_39] : memref<2x8x128xf32, #tpu.memory_space<vmem>>, vector<2x8x128xf32>
      tpu.vector_store %arg12[%c0_37, %c0_38, %c0_39], %49 {strides = array<i32>} : memref<2x8x128xf32, #tpu.memory_space<vmem>>, vector<2x8x128xf32>,
    } else {
    }
    return
  }
  func.func @transform_0(%arg0: i32, %arg1: i32, %arg2: i32) -> (i32, i32, i32) {
    %c0_i32 = arith.constant 0 : i32
    %c0_i32_0 = arith.constant 0 : i32
    return %arg0, %arg1, %c0_i32 : i32, i32, i32
  }
  func.func @transform_1(%arg0: i32, %arg1: i32, %arg2: i32) -> (i32, i32, i32) {
    %c0_i32 = arith.constant 0 : i32
    %c0_i32_0 = arith.constant 0 : i32
    return %arg0, %arg2, %c0_i32 : i32, i32, i32
  }
  func.func @transform_2(%arg0: i32, %arg1: i32, %arg2: i32) -> (i32, i32, i32) {
    %c0_i32 = arith.constant 0 : i32
    %c0_i32_0 = arith.constant 0 : i32
    return %arg0, %arg2, %c0_i32 : i32, i32, i32
  }
  func.func @transform_3(%arg0: i32, %arg1: i32, %arg2: i32) -> (i32, i32) {
    %c0_i32 = arith.constant 0 : i32
    %c0_i32_0 = arith.constant 0 : i32
    %c0_i32_1 = arith.constant 0 : i32
    return %c0_i32, %c0_i32_0 : i32, i32
  }
  func.func @transform_4(%arg0: i32, %arg1: i32, %arg2: i32) -> (i32, i32) {
    %c0_i32 = arith.constant 0 : i32
    %c0_i32_0 = arith.constant 0 : i32
    %c0_i32_1 = arith.constant 0 : i32
    return %c0_i32, %c0_i32_0 : i32, i32
  }
  func.func @transform_5(%arg0: i32, %arg1: i32, %arg2: i32) -> (i32, i32) {
    %c0_i32 = arith.constant 0 : i32
    %c0_i32_0 = arith.constant 0 : i32
    %c0_i32_1 = arith.constant 0 : i32
    return %c0_i32, %c0_i32_0 : i32, i32
  }
  func.func @transform_6(%arg0: i32, %arg1: i32, %arg2: i32) -> (i32, i32) {
    %c0_i32 = arith.constant 0 : i32
    %c0_i32_0 = arith.constant 0 : i32
    %c0_i32_1 = arith.constant 0 : i32
    return %c0_i32, %c0_i32_0 : i32, i32
  }
  func.func @transform_7(%arg0: i32, %arg1: i32, %arg2: i32) -> (i32, i32) {
    %c0_i32 = arith.constant 0 : i32
    %c0_i32_0 = arith.constant 0 : i32
    %c0_i32_1 = arith.constant 0 : i32
    return %c0_i32, %c0_i32_0 : i32, i32
  }
  func.func @transform_8(%arg0: i32, %arg1: i32, %arg2: i32) -> (i32, i32) {
    %c0_i32 = arith.constant 0 : i32
    %c0_i32_0 = arith.constant 0 : i32
    %c0_i32_1 = arith.constant 0 : i32
    return %c0_i32, %c0_i32_0 : i32, i32
  }
  func.func @transform_9(%arg0: i32, %arg1: i32, %arg2: i32) -> (i32, i32, i32) {
    %c0_i32 = arith.constant 0 : i32
    %c0_i32_0 = arith.constant 0 : i32
    return %arg0, %arg1, %c0_i32 : i32, i32, i32
  }
}

</mosaic_0001>

<bundles_post_ra>
// kernel: tpu_custom_call.1
= control target key start
LH: loop header
LB: loop body
LE: loop exit
PB: predicated region body
PF: predicated region fallthrough
CT: control target
= control target key end

     0   :  { %s1753_s0 = inlined_call_operand.hbm [shape: f32[4,8,128], index: 0, kind: input, shape index: {}]   ;;  %s1754_s1 = inlined_call_operand.hbm [shape: f32[4,16,128], index: 1, kind: input, shape index: {}]   ;;  %s1755_s2 = inlined_call_operand.hbm [shape: f32[4,16,128], index: 2, kind: input, shape index: {}]   ;;  %s1756_s3 = inlined_call_operand.hbm [shape: f32[128,128], index: 3, kind: input, shape index: {}]   ;;  %s1757_s4 = inlined_call_operand.vmem [shape: f32[1,128], index: 4, kind: input, shape index: {}]   ;;  %s1758_s5 = inlined_call_operand.hbm [shape: f32[128,128], index: 5, kind: input, shape index: {}]   ;;  %s1759_s6 = inlined_call_operand.vmem [shape: f32[1,128], index: 6, kind: input, shape index: {}]   ;;  %s1760_s7 = inlined_call_operand.vmem [shape: f32[1,128], index: 7, kind: input, shape index: {}]   ;;  %s1761_s8 = inlined_call_operand.vmem [shape: f32[1,128], index: 8, kind: input, shape index: {}]   ;;  %s1762_s9 = inlined_call_operand.hbm [shape: f32[4,8,128], index: 9, kind: output, shape index: {}]  }
   0x1   :  { %1776 = sst [smem:[#allocation27_spill]] %s1754_s1 }
   0x2   :  { %1777 = sst [smem:[#allocation28_spill]] %s1756_s3 }
   0x3   :  { %1778 = sst [smem:[#allocation29_spill]] %s1759_s6 }
   0x4   :  { %1779 = sst [smem:[#allocation30_spill]] %s1762_s9 }
   0x5   :  { %14 = vsyncpa [#allocation7], 0 }
   0x6   :  { %16 = vsyncpa [#allocation7 + $0x1], 0 }
   0x7   :  { %17 = vsyncpa [#allocation10], 0 }
   0x8   :  { %19 = vsyncpa [#allocation10 + $0x1], 0 }
   0x9   :  { %20 = vsyncpa [#allocation13], 0 }
   0xa   :  { %21 = vsyncpa [#allocation8], 0 }
   0xb   :  { %23 = vsyncpa [#allocation8 + $0x1], 0  ;;  %s1527_s30 = smov 0   ;;  %s1529_s10 = smov 0  }
   0xc   :  { %s1531_s11 = smov 0   ;;  %s1533_s7 = smov 0  }
   0xd   :  { %s1535_s12 = smov 0   ;;  %s1537_s8 = smov 0  }
   0xe LB: > { %1780 = sst [smem:[#allocation20_spill]] %s1448_s30  ;;  %s1558_s13 = sadd.s32 4294967295, %s1468_s8   ;;  %s1468_s8 = sphi %s1537_s8, %s29_s8   ;;  %s1464_s12 = sphi %s1535_s12, %s1810_s12   ;;  %s1460_s7 = sphi %s1533_s7, %s1809_s7   ;;  %s1456_s11 = sphi %s1531_s11, %s1805_s11   ;;  %s1452_s10 = sphi %s1529_s10, %s1808_s10   ;;  %s1448_s30 = sphi %s1527_s30, %s1807_s30  }
   0xf   : > { %1781 = sst [smem:[#allocation21_spill]] %s1456_s11  ;;  %s1080_s14 = sadd.s32 4294967294, %s1468_s8  }
  0x10   : > { %1782 = sst [smem:[#allocation22_spill]] %s1468_s8  ;;  %p70_p0 = scmp.ne.s32.totalorder %s1452_s10, %s1448_s30 }
  0x11   : > { %p71_p1 = scmp.eq.s32.totalorder %s1558_s13, 0  ;;  %p278_p2 = scmp.eq.s32.totalorder %s1558_s13, 1 }
  0x12   : > { %p284_p3 = scmp.eq.s32.totalorder %s1080_s14, 1  ;;  %p1081_p5 = scmp.ge.s32.totalorder %s1468_s8, 1 }
  0x13   : > { %p1567_p4 = por %p71_p1, %p70_p0  ;;  %p291_p7 = scmp.lt.s32.totalorder %s1468_s8, 3 }
  0x14   : > { %p1572_p6 = por %p284_p3, %p70_p0  ;;  %s1786_s3 = sld [smem:[#allocation28_spill]] }
  0x15   : > { %p1580_p8 = pnand %p1081_p5, %p291_p7  ;;  %s1470_s21 = smov [#allocation12]  }
  0x16   : > { %s1784_s16 = scalar_select %p1572_p6, 1, 0 }
  0x17   : > { %p1134_p9 = pneg %p1580_p8  ;;  %s304_s22 = sshll.u32 %s1470_s21, 4  ;;  %s305_s22 = int_to_ptr.vmem [resolvable:$true] %s304_s22 }
  0x18   : > { %1785 = sst [smem:[#allocation23_spill]] %s1784_s16  ;;  %s1763_s24 = smov 128  }
  0x19   : > { %p1588_p10 = pnand %p1134_p9, %p71_p1  ;;  %s1765_s25 = smov 8  }
  0x1a   : > { %s302_s19 = sshll.u32 %s1786_s3, 4  ;;  %s48_s26 = sadd.s32 1, %s1464_s12  ;;  %s303_s19 = int_to_ptr.hbm [resolvable:$true] %s302_s19 }
  0x1b   : > { %1137 = dma.hbm_to_vmem [thread:$0]  (!%p1588_p10), %s303_s19, 2048, %s305_s22, [#allocation13], %s1763_s24, %s1763_s24, %s1765_s25  }
  0x1c   : > { %p50_p12 = scmp.ge.s32.totalorder %s48_s26, 2  ;;  %s57_s27 = sadd.s32 1, %s1456_s11 }
  0x1d   : > { %p64_p13 = scmp.ne.s32.totalorder %s1456_s11, %s1452_s10  ;;  %p65_p0 = scmp.eq.s32.totalorder %s1468_s8, 0 }
  0x1e   : > { %s1812_s26 = smov (%p50_p12, %s48_s26), 0  ;;  %p1157_p7 = scmp.lt.s32.totalorder %s1468_s8, 2 }
  0x1f   : > { %1789 = sst [smem:[#allocation24_spill]] %s1812_s26  ;;  %p66_p3 = por %p65_p0, %p64_p13 }
  0x20   : > { %p1607_p5 = por %p278_p2, %p64_p13  ;;  %s52_s29 = ssub.s32 %s1464_s12, %s1812_s26 }
  0x21   : > { %p55_p9 = scmp.eq.s32.totalorder %s52_s29, 0  ;;  %s1615_s14 = sand.u32 1, %s1456_s11  }
  0x22   : > { %s1790_s28 = scalar_select %p1607_p5, 1, 0 }
  0x23   : > { %p1617_p11 = pnand %p1157_p7, %p66_p3  ;;  %s367_s18 = sand.u32 1, %s1468_s8  }
  0x24   : > { %1791 = sst [smem:[#allocation25_spill]] %s1790_s28  ;;  %s1088_s21 = sshll.u32 %s1615_s14, 5 }
  0x25   : > { %s1623_s19 = scalar_select %p55_p9, %s1456_s11, %s57_s27  }
  0x26   : > { %s1114_s22 = sshll.u32 %s1464_s12, 5  ;;  %s1794_s1 = sld [smem:[#allocation27_spill]] }
  0x27   : > { %1793 = sst [smem:[#allocation26_spill]] %s1623_s19  ;;  %s371_s16 = scalar_lea.vmem [#allocation9], %s1088_s21 }
  0x28   : > { %s382_s29 = sshll.u32 %s371_s16, 4  ;;  %s368_s30 = scalar_lea.sflag [#allocation10], %s367_s18  ;;  %s383_s29 = int_to_ptr.vmem [resolvable:$true] %s382_s29 }
  0x29   : > { %s1795_s28 = smov 8   ;;  %s1796_s8 = smov 128  }
  0x2a   : > { %s404_s11 = scalar_lea.hbm %s1755_s2, %s1114_s22  ;;  %s396_s25 = scalar_lea.vmem [#allocation11], %s1088_s21 }
  0x2b   : > { %s405_s24 = sshll.u32 %s404_s11, 4  ;;  %s319_s18 = sshll.u32 %s1758_s5, 4  ;;  %s406_s24 = int_to_ptr.hbm [resolvable:$true] %s405_s24  ;;  %s320_s18 = int_to_ptr.hbm [resolvable:$true] %s319_s18 }
  0x2c   : > { %s379_s3 = scalar_lea.hbm %s1794_s1, %s1114_s22  ;;  %s1473_s9 = smov [#allocation14]  }
  0x2d   : > { %s380_s26 = sshll.u32 %s379_s3, 4  ;;  %s407_s3 = sshll.u32 %s396_s25, 4  ;;  %s381_s26 = int_to_ptr.hbm [resolvable:$true] %s380_s26  ;;  %s408_s3 = int_to_ptr.vmem [resolvable:$true] %s407_s3 }
  0x2e   : > { %1147 = dma.hbm_to_vmem [thread:$0]  (!%p1617_p11), %s381_s26, 512, %s383_s29, %s368_s30, %s1796_s8, %s1796_s8, %s1795_s28  }
  0x2f   : > { %s321_s6 = sshll.u32 %s1473_s9, 4  ;;  %s1085_s11 = sshll.u32 %s1615_s14, 4  ;;  %s322_s6 = int_to_ptr.vmem [resolvable:$true] %s321_s6 }
  0x30   : > { %1140 = dma.hbm_to_vmem [thread:$0]  (!%p1588_p10), %s320_s18, 2048, %s322_s6, [#allocation13], %s1796_s8, %s1796_s8, %s1795_s28  }
  0x31   : > { %s1112_s26 = sshll.u32 %s1464_s12, 4  ;;  %s348_s1 = scalar_lea.vmem [#allocation6], %s1085_s11 }
  0x32   : > { %s354_s22 = scalar_lea.hbm %s1753_s0, %s1112_s26  ;;  %s357_s27 = sshll.u32 %s348_s1, 4  ;;  %s358_s27 = int_to_ptr.vmem [resolvable:$true] %s357_s27 }
  0x33   : > { %s355_s29 = sshll.u32 %s354_s22, 4  ;;  %s345_s25 = scalar_lea.sflag [#allocation7], %s1615_s14  ;;  %s356_s29 = int_to_ptr.hbm [resolvable:$true] %s355_s29 }
  0x34   : > { %1144 = dma.hbm_to_vmem [thread:$0]  (!%p1617_p11), %s356_s29, 256, %s358_s27, %s345_s25, %s1796_s8, %s1796_s8, %s1795_s28  }
  0x35   : > { %1150 = dma.hbm_to_vmem [thread:$0]  (!%p1617_p11), %s406_s24, 512, %s408_s3, %s368_s30, %s1796_s8, %s1796_s8, %s1795_s28  }
  0x36   : > { %419 = sbr.rel (%p1580_p8) target bundleno = 849 (0x351), region = 56  ;;  %s1665_s6 = sand.u32 (!%p1580_p8), 1, %s1452_s10  }
  0x37   : > { %s1097_s9 = sshll.u32 (!%p1580_p8), %s1665_s6, 4  ;;  %s422_s23 = scalar_lea.sflag (!%p1580_p8), [#allocation7], %s1665_s6 }
  0x38   : > { %s425_s14 = scalar_lea.vmem (!%p1580_p8), [#allocation6], %s1097_s9 }
  0x3b   : > { %1431 = dma.done.wait (%p1567_p4), %s422_s23, 256  }
  0x3c   : > { %1433 = vsyncadd (%p1567_p4), %s422_s23, 4294967040  ;;  %s431_s30 = sand.u32 1, %s1558_s13   ;;  %s1098_s8 = sshll.u32 %s1665_s6, 5 }
  0x3d   : > { %s432_s20 = scalar_lea.sflag [#allocation10], %s431_s30  ;;  %s435_s28 = scalar_lea.vmem [#allocation9], %s1098_s8 }
  0x3e   : > { %1435 = dma.done.wait (%p1567_p4), %s432_s20, 1024  }
  0x3f   : > { %1437 = vsyncadd (%p1567_p4), %s432_s20, 4294966272  ;;  %s1681_s17 = scalar_lea.vmem [#allocation11], %s1098_s8 }
  0x40   : > { %1439 = dma.done.wait (%p71_p1), [#allocation13], 4096  }
  0x41   : > { %1441 = vsyncadd (%p71_p1), [#allocation13], 4294963200  ;;  %v518_v0 = vld [vmem:[%s435_s28 + $0x8] sm:$0xff]  ;;  %v517_v1 = vld [vmem:[%s435_s28] sm:$0xff]  ;;  %v568_v8 = vlaneseq  ;;  %vm577_vm1 = vcmask 130048   ;;  %vm599_vm2 = vcmask 7168  }
  0x42   : > { %541 = vmatpush.xpose.msra.mxu0 %v518_v0  ;;  %v1687_v2 = vld [vmem:[%s425_s14] sm:$0xff]  ;;  %v520_v3 = vld [vmem:[%s435_s28 + $0x18] sm:$0xff]  ;;  %v522_v16 = vld [vmem:[%s1681_s17 + $0x8] sm:$0xff]  ;;  %v1474_v30 = vmov 0   ;;  %s1797_s16 = sld [smem:[#allocation29_spill]]  ;;  %s1117_s18 = sshll.u32 %s1460_s7, 4 }
  0x43   : > { %561 = vmatpush.xpose.msra.mxu1 %v520_v3  ;;  %v1689_v4 = vld [vmem:[%s425_s14 + $0x8] sm:$0xff]  ;;  %v519_v5 = vld [vmem:[%s435_s28 + $0x10] sm:$0xff]  ;;  %v513_v6 = vmul.f32 0.17677669, %v1687_v2  ;;  %v569_v9 = vand.u32 127, %v568_v8  ;;  %v521_v17 = vld [vmem:[%s1681_s17] sm:$0xff]  ;;  %1216 = vset.pattern.permute.xlu2 %v1474_v30 }
  0x44   : > { %v514_v7 = vmul.f32 0.17677669, %v1689_v4  ;;  %v524_v18 = vld [vmem:[%s1681_s17 + $0x18] sm:$0xff]  ;;  %v523_v19 = vld [vmem:[%s1681_s17 + $0x10] sm:$0xff]  ;;  %1217 = vset.pattern.permute.xlu0 %v1474_v30  ;;  %v827_v34 = vld [vmem:[#allocation12 + $0x68] sm:$0xff]  ;;  %s1798_s19 = sld [smem:[#allocation30_spill]] }
  0x45   : > { %vm572_vm0 = vcmp.lt.s32.totalorder %v569_v9, 8  ;;  %v829_v32 = vld [vmem:[#allocation12 + $0x78] sm:$0xff]  ;;  %v828_v33 = vld [vmem:[#allocation12 + $0x70] sm:$0xff]  ;;  %v826_v35 = vld [vmem:[#allocation12 + $0x60] sm:$0xff]  ;;  %s500_s29 = scalar_lea.vmem [#allocation15], %s1097_s9  ;;  %s907_s25 = scalar_lea.sflag [#allocation8], %s1665_s6 }
  0x46   : > { %542 = vmatpush.xpose.msra.mxu0 %v517_v1  ;;  %834 = vmatpush.msra.mxu2 %v829_v32  ;;  %v825_v38 = vld [vmem:[#allocation12 + $0x58] sm:$0xff]  ;;  %v824_v39 = vld [vmem:[#allocation12 + $0x50] sm:$0xff]  ;;  %v823_v40 = vld [vmem:[#allocation12 + $0x48] sm:$0xff]  ;;  %s920_s1 = sshll.u32 %s500_s29, 4  ;;  %s921_s1 = int_to_ptr.vmem [resolvable:$true] %s920_s1 }
  0x47   : > { %562 = vmatpush.xpose.msra.mxu1 %v519_v5  ;;  %v822_v41 = vld [vmem:[#allocation12 + $0x40] sm:$0xff]  ;;  %v821_v45 = vld [vmem:[#allocation12 + $0x38] sm:$0xff]  ;;  %v820_v47 = vld [vmem:[#allocation12 + $0x30] sm:$0xff] }
  0x48   : > { %835 = vmatpush.msra.mxu2 %v828_v33  ;;  %v819_v51 = vld [vmem:[#allocation12 + $0x28] sm:$0xff]  ;;  %v818_v53 = vld [vmem:[#allocation12 + $0x20] sm:$0xff]  ;;  %v817_v58 = vld [vmem:[#allocation12 + $0x18] sm:$0xff] }
  0x49   : > { %543 = vmatmul.f32.vlgmr.msra.gmra.mxu0 %v513_v6  ;;  %v816_v61 = vld [vmem:[#allocation12 + $0x10] sm:$0xff]  ;;  %v814_v8 = vld [vmem:[#allocation12] sm:$0xff]  ;;  %v874_v9 = vld [vmem:[#allocation14 + $0x78] sm:$0xff] }
  0x4a   : > { %563 = vmatmul.f32.vlgmr.msra.gmra.mxu1 %v514_v7  ;;  %619 = vmatpush.msrb.mxu0 %v522_v16  ;;  %v815_v7 = vld [vmem:[#allocation12 + $0x8] sm:$0xff]  ;;  %v867_v16 = vld [vmem:[#allocation14 + $0x40] sm:$0xff]  ;;  %v861_v30 = vld [vmem:[#allocation14 + $0x10] sm:$0xff]  ;;  %s919_s21 = scalar_lea.hbm %s1798_s19, %s1117_s18  ;;  %s1398_s9 = scalar_lea.hbm %s1798_s19, 32 }
  0x4b   : > { %642 = vmatpush.msrb.mxu1 %v524_v18  ;;  %836 = vmatpush.msra.mxu2 %v827_v34  ;;  %v865_v18 = vld [vmem:[#allocation14 + $0x30] sm:$0xff]  ;;  %v859_v32 = vld [vmem:[#allocation14] sm:$0xff]  ;;  %s922_s27 = sshll.u32 %s919_s21, 4  ;;  %s923_s27 = int_to_ptr.hbm [resolvable:$true] %s922_s27 }
  0x4c   : > { %620 = vmatpush.msrb.mxu0 %v521_v17  ;;  %879 = vmatpush.msra.mxu3 %v874_v9  ;;  %v866_v17 = vld [vmem:[#allocation14 + $0x38] sm:$0xff]  ;;  %s1392_s23 = sshra.s32 %s923_s27, 4  ;;  %s1393_s23 = int_to_ptr.hbm [resolvable:$true] %s1392_s23 }
  0x4d   : > { %643 = vmatpush.msrb.mxu1 %v523_v19  ;;  %837 = vmatpush.msra.mxu2 %v826_v35  ;;  %v864_v19 = vld [vmem:[#allocation14 + $0x28] sm:$0xff]  ;;  %s1394_s7 = scalar_lea.hbm %s1393_s23, 16  ;;  %p1399_p8 = scmp.lt.s32.totalorder %s1393_s23, %s1798_s19 }
  0x4e   : > { %p1395_p1 = scmp.ne.s32.totalorder %s1393_s23, %s1394_s7  ;;  %p1400_p10 = scmp.lt.s32.totalorder %s1398_s9, %s1394_s7 }
  0x4f   : > { %838 = vmatpush.msra.mxu2 %v825_v38  ;;  %v1219_v38 = vld [vmem:[%s1797_s16] ss:$0 sm:$0xff] }
  0x50   : > { %p1396_p2 = pnand %p1395_p1, %p1607_p5  ;;  %p1401_p11 = por %p1400_p10, %p1399_p8 }
  0x51   : > { %839 = vmatpush.msra.mxu2 %v824_v39 }
  0x52   : > { %p1397_p4 = pneg %p1396_p2 }
  0x53   : > { %840 = vmatpush.msra.mxu2 %v823_v40 }
  0x54   : > { %p1402_p12 = pnand %p1401_p11, %p1397_p4 }
  0x55   : > { %841 = vmatpush.msra.mxu2 %v822_v41 }
  0x57   : > { %842 = vmatpush.msra.mxu2 %v821_v45 }
  0x59   : > { %843 = vmatpush.msra.mxu2 %v820_v47 }
  0x5b   : > { %844 = vmatpush.msra.mxu2 %v819_v51 }
  0x5d   : > { %845 = vmatpush.msra.mxu2 %v818_v53 }
  0x5f   : > { %846 = vmatpush.msra.mxu2 %v817_v58 }
  0x61   : > { %847 = vmatpush.msra.mxu2 %v816_v61 }
  0x63   : > { %848 = vmatpush.msra.mxu2 %v815_v7 }
  0x65   : > { %849 = vmatpush.msra.mxu2 %v814_v8 }
  0xc6   : > { %v544_v10 = vpop.f32.mrf.mxu0 }
  0xc7   : > { %v575_v11 = vsel %vm572_vm0, %v544_v10, -1e+30  ;;  %v564_v13 = vpop.f32.mrf.mxu1  ;;  %v873_v10 = vld [vmem:[#allocation14 + $0x70] sm:$0xff] }
  0xc8   : > { %v578_v12 = vsel %vm577_vm1, %v575_v11, -inf  ;;  %v576_v14 = vsel %vm572_vm0, %v564_v13, -1e+30  ;;  %880 = vmatpush.msra.mxu3 %v873_v10  ;;  %v870_v13 = vld [vmem:[#allocation14 + $0x58] sm:$0xff] }
  0xc9   : > { %579 = vmax.xlane.f32.xlu0 %v578_v12  ;;  %v581_v15 = vsel %vm577_vm1, %v576_v14, -inf  ;;  %v871_v12 = vld [vmem:[#allocation14 + $0x60] sm:$0xff] }
  0xd1   : > { %582 = vmax.xlane.f32.xlu0 %v581_v15  ;;  %v868_v15 = vld [vmem:[#allocation14 + $0x48] sm:$0xff] }
 0x13c   : > { %v580_v20 = vpop.xlane.xlu0 %579 }
 0x13d   : > { %v587_v21 = vsub.f32 %v575_v11, %v580_v20  ;;  %v872_v11 = vld [vmem:[#allocation14 + $0x68] sm:$0xff] }
 0x13e   : > { %881 = vmatpush.msra.mxu3 %v872_v11 }
 0x13f   : > { %v589_v22 = vmul.f32 1.442695, %v587_v21 }
 0x140   : > { %882 = vmatpush.msra.mxu3 %v871_v12 }
 0x141   : > { %1220 = vpow2.f32 %v589_v22 }
 0x142   : > { %883 = vmatpush.msra.mxu3 %v870_v13 }
 0x144   : > { %v583_v23 = vpop.xlane.xlu0 %582 }
 0x145   : > { %v588_v24 = vsub.f32 %v576_v14, %v583_v23  ;;  %v869_v14 = vld [vmem:[#allocation14 + $0x50] sm:$0xff]  ;;  %v863_v23 = vld [vmem:[#allocation14 + $0x20] sm:$0xff] }
 0x146   : > { %884 = vmatpush.msra.mxu3 %v869_v14 }
 0x147   : > { %v1221_v25 = vpop.eup %1220  ;;  %v591_v26 = vmul.f32 1.442695, %v588_v24 }
 0x148   : > { %1103 = vmatmul.msk.f32.vlgmr.msrb.gmra.mxu0 %vm577_vm1, %v1221_v25  ;;  %v593_v27 = vsel %vm577_vm1, %v1221_v25, 0.0  ;;  %885 = vmatpush.msra.mxu3 %v868_v15  ;;  %v862_v25 = vld [vmem:[#allocation14 + $0x18] sm:$0xff] }
 0x149   : > { %1222 = vpow2.f32 %v591_v26  ;;  %594 = vadd.xlane.f32.xlu1 %v593_v27 }
 0x14a   : > { %886 = vmatpush.msra.mxu3 %v867_v16 }
 0x14c   : > { %887 = vmatpush.msra.mxu3 %v866_v17 }
 0x14e   : > { %888 = vmatpush.msra.mxu3 %v865_v18 }
 0x14f   : > { %v1223_v28 = vpop.eup %1222 }
 0x150   : > { %1104 = vmatmul.msk.f32.vlgmr.msrb.gmra.mxu1 %vm577_vm1, %v1223_v28  ;;  %v596_v29 = vsel %vm577_vm1, %v1223_v28, 0.0  ;;  %889 = vmatpush.msra.mxu3 %v864_v19 }
 0x151   : > { %597 = vadd.xlane.f32.xlu1 %v596_v29 }
 0x152   : > { %890 = vmatpush.msra.mxu3 %v863_v23 }
 0x154   : > { %891 = vmatpush.msra.mxu3 %v862_v25 }
 0x156   : > { %892 = vmatpush.msra.mxu3 %v861_v30 }
 0x1bc   : > { %v595_v31 = vpop.xlane.xlu1 %594 }
 0x1bd   : > { %600 = vst.msk [vmem:[#allocation4] sm:$0xff] %vm599_vm2, %v595_v31  ;;  %v860_v31 = vld [vmem:[#allocation14 + $0x8] sm:$0xff] }
 0x1be   : > { %893 = vmatpush.msra.mxu3 %v860_v31 }
 0x1c0   : > { %894 = vmatpush.msra.mxu3 %v859_v32 }
 0x1c4   : > { %v598_v36 = vpop.xlane.xlu1 %597  ;;  %v766_v37 = vld [vmem:[#allocation4] sm:$0xff] }
 0x1c5   : > { %601 = vst.msk [vmem:[#allocation4 + $0x8] sm:$0xff] %vm599_vm2, %v598_v36  ;;  %1224 = vrcp.f32 %v766_v37  ;;  %v779_v48 = vand.u32 2147483648, %v766_v37  ;;  %v777_v50 = vand.u32 2147483647, %v766_v37  ;;  %vm773_vm4 = vweird.f32 %v766_v37  ;;  %v622_v20 = vpop.f32.mrf.mxu0 }
 0x1c7   : > { %v780_v55 = vor.u32 1.1754944e-38, %v779_v48  ;;  %vm778_vm6 = vcmp.eq.f32.partialorder %v777_v50, 8.507059e+37 }
 0x1cb   : > { %v1225_v42 = vpop.eup %1224 }
 0x1cc   : > { %v769_v43 = vmul.f32 %v1225_v42, %v766_v37  ;;  %v767_v44 = vld [vmem:[#allocation4 + $0x8] sm:$0xff]  ;;  %vm774_vm3 = vweird.f32 %v1225_v42 }
 0x1cd   : > { %1226 = vrcp.f32 %v767_v44  ;;  %vm775_vm5 = vmor %vm773_vm4, %vm774_vm3  ;;  %v793_v62 = vand.u32 2147483648, %v767_v44  ;;  %v791_v0 = vand.u32 2147483647, %v767_v44  ;;  %vm787_vm8 = vweird.f32 %v767_v44  ;;  %v645_v26 = vpop.f32.mrf.mxu1 }
 0x1ce   : > { %v770_v46 = vsub.f32 1.0, %v769_v43 }
 0x1cf   : > { %v794_v3 = vor.u32 1.1754944e-38, %v793_v62  ;;  %vm792_vm10 = vcmp.eq.f32.partialorder %v791_v0, 8.507059e+37 }
 0x1d0   : > { %v771_v49 = vmul.f32 %v1225_v42, %v770_v46 }
 0x1d2   : > { %v772_v52 = vadd.f32 %v1225_v42, %v771_v49 }
 0x1d3   : > { %v1227_v54 = vpop.eup %1226 }
 0x1d4   : > { %v776_v56 = vsel %vm775_vm5, %v1225_v42, %v772_v52  ;;  %v783_v57 = vmul.f32 %v1227_v54, %v767_v44  ;;  %vm788_vm7 = vweird.f32 %v1227_v54 }
 0x1d5   : > { %v781_v59 = vsel %vm778_vm6, %v780_v55, %v776_v56  ;;  %vm789_vm9 = vmor %vm787_vm8, %vm788_vm7 }
 0x1d6   : > { %802 = vperm.xlu2 %1216, %v781_v59   ;;  %v784_v60 = vsub.f32 1.0, %v783_v57 }
 0x1d8   : > { %v785_v63 = vmul.f32 %v1227_v54, %v784_v60 }
 0x1da   : > { %v786_v1 = vadd.f32 %v1227_v54, %v785_v63 }
 0x1dc   : > { %v790_v5 = vsel %vm789_vm9, %v1227_v54, %v786_v1 }
 0x1dd   : > { %v795_v6 = vsel %vm792_vm10, %v794_v3, %v790_v5 }
 0x1de   : > { %807 = vperm.xlu2 %1216, %v795_v6  }
 0x230   : > { %v803_v21 = vpop.permute.xlu2 %802 }
 0x231   : > { %v810_v22 = vmul.f32 %v803_v21, %v622_v20 }
 0x233   : > { %v812_v24 = vadd.f32 %v810_v22, %v1687_v2  ;;  %v1218_v2 = vld [vmem:[%s1757_s4] ss:$0 sm:$0xff] }
 0x235   : > { %850 = vmatmul.f32.vlgmr.msra.gmra.mxu2 %v812_v24 }
 0x238   : > { %v808_v27 = vpop.permute.xlu2 %807 }
 0x239   : > { %v811_v28 = vmul.f32 %v808_v27, %v645_v26 }
 0x23b   : > { %v813_v29 = vadd.f32 %v811_v28, %v1689_v4 }
 0x23d   : > { %853 = vmatmul.f32.gmra.mxu2 %v813_v29 }
 0x2b8   : > { %v851_v33 = vpop.f32.mrf.mxu2 }
 0x2b9   : > { %v852_v34 = vadd.f32 %v1218_v2, %v851_v33 }
 0x2bb   : > { %v857_v35 = vmax.f32 %v852_v34, 0.0 }
 0x2bd   : > { %895 = vmatmul.f32.vlgmr.msra.gmra.mxu3 %v857_v35 }
 0x2c0   : > { %v854_v36 = vpop.f32.mrf.mxu2 }
 0x2c1   : > { %v855_v37 = vadd.f32 %v1218_v2, %v854_v36 }
 0x2c3   : > { %v858_v4 = vmax.f32 %v855_v37, 0.0 }
 0x2c5   : > { %898 = vmatmul.f32.gmra.mxu3 %v858_v4 }
 0x340   : > { %v896_v39 = vpop.f32.mrf.mxu3 }
 0x341   : > { %v897_v40 = vadd.f32 %v1219_v38, %v896_v39 }
 0x343   : > { %v902_v41 = vadd.f32 %v897_v40, %v812_v24 }
 0x345   : > { %904 = vst [vmem:[%s500_s29] sm:$0xff] %v902_v41 }
 0x348   : > { %v899_v42 = vpop.f32.mrf.mxu3 }
 0x349   : > { %v900_v43 = vadd.f32 %v1219_v38, %v899_v42 }
 0x34b   : > { %v903_v44 = vadd.f32 %v900_v43, %v813_v29 }
 0x34d   : > { %905 = vst [vmem:[%s500_s29 + $0x8] sm:$0xff] %v903_v44 }
 0x34e   : > { %1405 = shalt.err (!%p1402_p12)
}
 0x34f   : > { %s1475_s6 = smov 128   ;;  %s1476_s28 = smov 8  }
 0x350   : > { %1132 = dma.vmem_to_hbm [thread:$0]  (%p1607_p5), %s921_s1, 256, %s923_s27, %s907_s25, %s1475_s6, %s1475_s6, %s1476_s28  }
 0x351 PF: > { %s1800_s17 = sld [smem:[#allocation20_spill]] }
 0x352   : > { %s1802_s15 = sld [smem:[#allocation22_spill]] }
 0x357   : > { %s937_s24 = sand.u32 1, %s1800_s17  }
 0x358   : > { %p1803_p13 = scmp.ge.s32.totalorder %s1802_s15, 2  ;;  %s938_s3 = scalar_lea.sflag [#allocation8], %s937_s24 }
 0x35a   : > { %p1152_p0 = pnand %p1803_p13, %p1572_p6 }
 0x35c   : > { %p1153_p3 = pneg %p1152_p0 }
 0x35e   : > { %1443 = dma.done.wait (%p1153_p3), %s938_s3, 256  }
 0x35f   : > { %1445 = vsyncadd (%p1153_p3), %s938_s3, 4294967040  ;;  %s29_s8 = sadd.s32 1, %s1802_s15   ;;  %s1804_s16 = sld [smem:[#allocation21_spill]] }
 0x360   : > { %p26_p7 = scmp.ge.s32.totalorder %s29_s8, 4   ;;  %s1805_s11 = sld [smem:[#allocation26_spill]] }
 0x361   : > { %s1806_s18 = sld [smem:[#allocation24_spill]]  ;;  %s1807_s30 = smov %s1452_s10 }
 0x362   : > { %s1809_s7 = smov %s1464_s12 }
 0x363   :  { %28 = sbr.rel (!%p26_p7) target bundleno = 14 (0xe), region = 149 }
 0x365   : > { %s1808_s10 = smov %s1804_s16 }
 0x367   : > { %s1810_s12 = smov %s1806_s18 }
 0x368   :  { %944 = vsyncpa [#allocation7], 1 }
 0x369   :  { %946 = vsyncpa [#allocation7 + $0x1], 1 }
 0x36a   :  { %947 = vsyncpa [#allocation10], 1 }
 0x36b   :  { %949 = vsyncpa [#allocation10 + $0x1], 1 }
 0x36c   :  { %950 = vsyncpa [#allocation13], 1 }
 0x36d   :  { %951 = vsyncpa [#allocation8], 1 }
 0x36e   :  { %953 = vsyncpa [#allocation8 + $0x1], 1 }

// kernel: tpu_custom_call.1
= control target key start
LH: loop header
LB: loop body
LE: loop exit
PB: predicated region body
PF: predicated region fallthrough
CT: control target
= control target key end

     0   :  { %s1753_s0 = inlined_call_operand.hbm [shape: f32[4,8,128], index: 0, kind: input, shape index: {}]   ;;  %s1754_s1 = inlined_call_operand.hbm [shape: f32[4,16,128], index: 1, kind: input, shape index: {}]   ;;  %s1755_s2 = inlined_call_operand.hbm [shape: f32[4,16,128], index: 2, kind: input, shape index: {}]   ;;  %s1756_s3 = inlined_call_operand.hbm [shape: f32[128,128], index: 3, kind: input, shape index: {}]   ;;  %s1757_s4 = inlined_call_operand.vmem [shape: f32[1,128], index: 4, kind: input, shape index: {}]   ;;  %s1758_s5 = inlined_call_operand.hbm [shape: f32[128,128], index: 5, kind: input, shape index: {}]   ;;  %s1759_s6 = inlined_call_operand.vmem [shape: f32[1,128], index: 6, kind: input, shape index: {}]   ;;  %s1760_s7 = inlined_call_operand.vmem [shape: f32[1,128], index: 7, kind: input, shape index: {}]   ;;  %s1761_s8 = inlined_call_operand.vmem [shape: f32[1,128], index: 8, kind: input, shape index: {}]   ;;  %s1762_s9 = inlined_call_operand.hbm [shape: f32[4,8,128], index: 9, kind: output, shape index: {}]  }
   0x1   :  { %1776 = sst [smem:[#allocation27_spill]] %s1754_s1 }
   0x2   :  { %1777 = sst [smem:[#allocation28_spill]] %s1756_s3 }
   0x3   :  { %1778 = sst [smem:[#allocation29_spill]] %s1759_s6 }
   0x4   :  { %1779 = sst [smem:[#allocation30_spill]] %s1762_s9 }
   0x5   :  { %14 = vsyncpa [#allocation7], 0 }
   0x6   :  { %16 = vsyncpa [#allocation7 + $0x1], 0 }
   0x7   :  { %17 = vsyncpa [#allocation10], 0 }
   0x8   :  { %19 = vsyncpa [#allocation10 + $0x1], 0 }
   0x9   :  { %20 = vsyncpa [#allocation13], 0 }
   0xa   :  { %21 = vsyncpa [#allocation8], 0 }
   0xb   :  { %23 = vsyncpa [#allocation8 + $0x1], 0  ;;  %s1527_s30 = smov 0   ;;  %s1529_s10 = smov 0  }
   0xc   :  { %s1531_s11 = smov 0   ;;  %s1533_s7 = smov 0  }
   0xd   :  { %s1535_s12 = smov 0   ;;  %s1537_s8 = smov 0  }
   0xe LB: > { %1780 = sst [smem:[#allocation20_spill]] %s1448_s30  ;;  %s1558_s13 = sadd.s32 4294967295, %s1468_s8   ;;  %s1468_s8 = sphi %s1537_s8, %s29_s8   ;;  %s1464_s12 = sphi %s1535_s12, %s1810_s12   ;;  %s1460_s7 = sphi %s1533_s7, %s1809_s7   ;;  %s1456_s11 = sphi %s1531_s11, %s1805_s11   ;;  %s1452_s10 = sphi %s1529_s10, %s1808_s10   ;;  %s1448_s30 = sphi %s1527_s30, %s1807_s30  }
   0xf   : > { %1781 = sst [smem:[#allocation21_spill]] %s1456_s11  ;;  %s1080_s14 = sadd.s32 4294967294, %s1468_s8  }
  0x10   : > { %1782 = sst [smem:[#allocation22_spill]] %s1468_s8  ;;  %p70_p0 = scmp.ne.s32.totalorder %s1452_s10, %s1448_s30 }
  0x11   : > { %p71_p1 = scmp.eq.s32.totalorder %s1558_s13, 0  ;;  %p278_p2 = scmp.eq.s32.totalorder %s1558_s13, 1 }
  0x12   : > { %p284_p3 = scmp.eq.s32.totalorder %s1080_s14, 1  ;;  %p1081_p5 = scmp.ge.s32.totalorder %s1468_s8, 1 }
  0x13   : > { %p1567_p4 = por %p71_p1, %p70_p0  ;;  %p291_p7 = scmp.lt.s32.totalorder %s1468_s8, 3 }
  0x14   : > { %p1572_p6 = por %p284_p3, %p70_p0  ;;  %s1786_s3 = sld [smem:[#allocation28_spill]] }
  0x15   : > { %p1580_p8 = pnand %p1081_p5, %p291_p7  ;;  %s1470_s21 = smov [#allocation12]  }
  0x16   : > { %s1784_s16 = scalar_select %p1572_p6, 1, 0 }
  0x17   : > { %p1134_p9 = pneg %p1580_p8  ;;  %s304_s22 = sshll.u32 %s1470_s21, 4  ;;  %s305_s22 = int_to_ptr.vmem [resolvable:$true] %s304_s22 }
  0x18   : > { %1785 = sst [smem:[#allocation23_spill]] %s1784_s16  ;;  %s1763_s24 = smov 128  }
  0x19   : > { %p1588_p10 = pnand %p1134_p9, %p71_p1  ;;  %s1765_s25 = smov 8  }
  0x1a   : > { %s302_s19 = sshll.u32 %s1786_s3, 4  ;;  %s48_s26 = sadd.s32 1, %s1464_s12  ;;  %s303_s19 = int_to_ptr.hbm [resolvable:$true] %s302_s19 }
  0x1b   : > { %1137 = dma.hbm_to_vmem [thread:$0]  (!%p1588_p10), %s303_s19, 2048, %s305_s22, [#allocation13], %s1763_s24, %s1763_s24, %s1765_s25  }
  0x1c   : > { %p50_p12 = scmp.ge.s32.totalorder %s48_s26, 2  ;;  %s57_s27 = sadd.s32 1, %s1456_s11 }
  0x1d   : > { %p64_p13 = scmp.ne.s32.totalorder %s1456_s11, %s1452_s10  ;;  %p65_p0 = scmp.eq.s32.totalorder %s1468_s8, 0 }
  0x1e   : > { %s1812_s26 = smov (%p50_p12, %s48_s26), 0  ;;  %p1157_p7 = scmp.lt.s32.totalorder %s1468_s8, 2 }
  0x1f   : > { %1789 = sst [smem:[#allocation24_spill]] %s1812_s26  ;;  %p66_p3 = por %p65_p0, %p64_p13 }
  0x20   : > { %p1607_p5 = por %p278_p2, %p64_p13  ;;  %s52_s29 = ssub.s32 %s1464_s12, %s1812_s26 }
  0x21   : > { %p55_p9 = scmp.eq.s32.totalorder %s52_s29, 0  ;;  %s1615_s14 = sand.u32 1, %s1456_s11  }
  0x22   : > { %s1790_s28 = scalar_select %p1607_p5, 1, 0 }
  0x23   : > { %p1617_p11 = pnand %p1157_p7, %p66_p3  ;;  %s367_s18 = sand.u32 1, %s1468_s8  }
  0x24   : > { %1791 = sst [smem:[#allocation25_spill]] %s1790_s28  ;;  %s1088_s21 = sshll.u32 %s1615_s14, 5 }
  0x25   : > { %s1623_s19 = scalar_select %p55_p9, %s1456_s11, %s57_s27  }
  0x26   : > { %s1114_s22 = sshll.u32 %s1464_s12, 5  ;;  %s1794_s1 = sld [smem:[#allocation27_spill]] }
  0x27   : > { %1793 = sst [smem:[#allocation26_spill]] %s1623_s19  ;;  %s371_s16 = scalar_lea.vmem [#allocation9], %s1088_s21 }
  0x28   : > { %s382_s29 = sshll.u32 %s371_s16, 4  ;;  %s368_s30 = scalar_lea.sflag [#allocation10], %s367_s18  ;;  %s383_s29 = int_to_ptr.vmem [resolvable:$true] %s382_s29 }
  0x29   : > { %s1795_s28 = smov 8   ;;  %s1796_s8 = smov 128  }
  0x2a   : > { %s404_s11 = scalar_lea.hbm %s1755_s2, %s1114_s22  ;;  %s396_s25 = scalar_lea.vmem [#allocation11], %s1088_s21 }
  0x2b   : > { %s405_s24 = sshll.u32 %s404_s11, 4  ;;  %s319_s18 = sshll.u32 %s1758_s5, 4  ;;  %s406_s24 = int_to_ptr.hbm [resolvable:$true] %s405_s24  ;;  %s320_s18 = int_to_ptr.hbm [resolvable:$true] %s319_s18 }
  0x2c   : > { %s379_s3 = scalar_lea.hbm %s1794_s1, %s1114_s22  ;;  %s1473_s9 = smov [#allocation14]  }
  0x2d   : > { %s380_s26 = sshll.u32 %s379_s3, 4  ;;  %s407_s3 = sshll.u32 %s396_s25, 4  ;;  %s381_s26 = int_to_ptr.hbm [resolvable:$true] %s380_s26  ;;  %s408_s3 = int_to_ptr.vmem [resolvable:$true] %s407_s3 }
  0x2e   : > { %1147 = dma.hbm_to_vmem [thread:$0]  (!%p1617_p11), %s381_s26, 512, %s383_s29, %s368_s30, %s1796_s8, %s1796_s8, %s1795_s28  }
  0x2f   : > { %s321_s6 = sshll.u32 %s1473_s9, 4  ;;  %s1085_s11 = sshll.u32 %s1615_s14, 4  ;;  %s322_s6 = int_to_ptr.vmem [resolvable:$true] %s321_s6 }
  0x30   : > { %1140 = dma.hbm_to_vmem [thread:$0]  (!%p1588_p10), %s320_s18, 2048, %s322_s6, [#allocation13], %s1796_s8, %s1796_s8, %s1795_s28  }
  0x31   : > { %s1112_s26 = sshll.u32 %s1464_s12, 4  ;;  %s348_s1 = scalar_lea.vmem [#allocation6], %s1085_s11 }
  0x32   : > { %s354_s22 = scalar_lea.hbm %s1753_s0, %s1112_s26  ;;  %s357_s27 = sshll.u32 %s348_s1, 4  ;;  %s358_s27 = int_to_ptr.vmem [resolvable:$true] %s357_s27 }
  0x33   : > { %s355_s29 = sshll.u32 %s354_s22, 4  ;;  %s345_s25 = scalar_lea.sflag [#allocation7], %s1615_s14  ;;  %s356_s29 = int_to_ptr.hbm [resolvable:$true] %s355_s29 }
  0x34   : > { %1144 = dma.hbm_to_vmem [thread:$0]  (!%p1617_p11), %s356_s29, 256, %s358_s27, %s345_s25, %s1796_s8, %s1796_s8, %s1795_s28  }
  0x35   : > { %1150 = dma.hbm_to_vmem [thread:$0]  (!%p1617_p11), %s406_s24, 512, %s408_s3, %s368_s30, %s1796_s8, %s1796_s8, %s1795_s28  }
  0x36   : > { %419 = sbr.rel (%p1580_p8) target bundleno = 849 (0x351), region = 56  ;;  %s1665_s6 = sand.u32 (!%p1580_p8), 1, %s1452_s10  }
  0x37   : > { %s1097_s9 = sshll.u32 (!%p1580_p8), %s1665_s6, 4  ;;  %s422_s23 = scalar_lea.sflag (!%p1580_p8), [#allocation7], %s1665_s6 }
  0x38   : > { %s425_s14 = scalar_lea.vmem (!%p1580_p8), [#allocation6], %s1097_s9 }
  0x3b   : > { %1431 = dma.done.wait (%p1567_p4), %s422_s23, 256  }
  0x3c   : > { %1433 = vsyncadd (%p1567_p4), %s422_s23, 4294967040  ;;  %s431_s30 = sand.u32 1, %s1558_s13   ;;  %s1098_s8 = sshll.u32 %s1665_s6, 5 }
  0x3d   : > { %s432_s20 = scalar_lea.sflag [#allocation10], %s431_s30  ;;  %s435_s28 = scalar_lea.vmem [#allocation9], %s1098_s8 }
  0x3e   : > { %1435 = dma.done.wait (%p1567_p4), %s432_s20, 1024  }
  0x3f   : > { %1437 = vsyncadd (%p1567_p4), %s432_s20, 4294966272  ;;  %s1681_s17 = scalar_lea.vmem [#allocation11], %s1098_s8 }
  0x40   : > { %1439 = dma.done.wait (%p71_p1), [#allocation13], 4096  }
  0x41   : > { %1441 = vsyncadd (%p71_p1), [#allocation13], 4294963200  ;;  %v518_v0 = vld [vmem:[%s435_s28 + $0x8] sm:$0xff]  ;;  %v517_v1 = vld [vmem:[%s435_s28] sm:$0xff]  ;;  %v568_v8 = vlaneseq  ;;  %vm577_vm1 = vcmask 130048   ;;  %vm599_vm2 = vcmask 7168  }
  0x42   : > { %541 = vmatpush.xpose.msra.mxu0 %v518_v0  ;;  %v1687_v2 = vld [vmem:[%s425_s14] sm:$0xff]  ;;  %v520_v3 = vld [vmem:[%s435_s28 + $0x18] sm:$0xff]  ;;  %v522_v16 = vld [vmem:[%s1681_s17 + $0x8] sm:$0xff]  ;;  %v1474_v30 = vmov 0   ;;  %s1797_s16 = sld [smem:[#allocation29_spill]]  ;;  %s1117_s18 = sshll.u32 %s1460_s7, 4 }
  0x43   : > { %561 = vmatpush.xpose.msra.mxu1 %v520_v3  ;;  %v1689_v4 = vld [vmem:[%s425_s14 + $0x8] sm:$0xff]  ;;  %v519_v5 = vld [vmem:[%s435_s28 + $0x10] sm:$0xff]  ;;  %v513_v6 = vmul.f32 0.17677669, %v1687_v2  ;;  %v569_v9 = vand.u32 127, %v568_v8  ;;  %v521_v17 = vld [vmem:[%s1681_s17] sm:$0xff]  ;;  %1216 = vset.pattern.permute.xlu2 %v1474_v30 }
  0x44   : > { %v514_v7 = vmul.f32 0.17677669, %v1689_v4  ;;  %v524_v18 = vld [vmem:[%s1681_s17 + $0x18] sm:$0xff]  ;;  %v523_v19 = vld [vmem:[%s1681_s17 + $0x10] sm:$0xff]  ;;  %1217 = vset.pattern.permute.xlu0 %v1474_v30  ;;  %v827_v34 = vld [vmem:[#allocation12 + $0x68] sm:$0xff]  ;;  %s1798_s19 = sld [smem:[#allocation30_spill]] }
  0x45   : > { %vm572_vm0 = vcmp.lt.s32.totalorder %v569_v9, 8  ;;  %v829_v32 = vld [vmem:[#allocation12 + $0x78] sm:$0xff]  ;;  %v828_v33 = vld [vmem:[#allocation12 + $0x70] sm:$0xff]  ;;  %v826_v35 = vld [vmem:[#allocation12 + $0x60] sm:$0xff]  ;;  %s500_s29 = scalar_lea.vmem [#allocation15], %s1097_s9  ;;  %s907_s25 = scalar_lea.sflag [#allocation8], %s1665_s6 }
  0x46   : > { %542 = vmatpush.xpose.msra.mxu0 %v517_v1  ;;  %834 = vmatpush.msra.mxu2 %v829_v32  ;;  %v825_v38 = vld [vmem:[#allocation12 + $0x58] sm:$0xff]  ;;  %v824_v39 = vld [vmem:[#allocation12 + $0x50] sm:$0xff]  ;;  %v823_v40 = vld [vmem:[#allocation12 + $0x48] sm:$0xff]  ;;  %s920_s1 = sshll.u32 %s500_s29, 4  ;;  %s921_s1 = int_to_ptr.vmem [resolvable:$true] %s920_s1 }
  0x47   : > { %562 = vmatpush.xpose.msra.mxu1 %v519_v5  ;;  %v822_v41 = vld [vmem:[#allocation12 + $0x40] sm:$0xff]  ;;  %v821_v45 = vld [vmem:[#allocation12 + $0x38] sm:$0xff]  ;;  %v820_v47 = vld [vmem:[#allocation12 + $0x30] sm:$0xff] }
  0x48   : > { %835 = vmatpush.msra.mxu2 %v828_v33  ;;  %v819_v51 = vld [vmem:[#allocation12 + $0x28] sm:$0xff]  ;;  %v818_v53 = vld [vmem:[#allocation12 + $0x20] sm:$0xff]  ;;  %v817_v58 = vld [vmem:[#allocation12 + $0x18] sm:$0xff] }
  0x49   : > { %543 = vmatmul.f32.vlgmr.msra.gmra.mxu0 %v513_v6  ;;  %v816_v61 = vld [vmem:[#allocation12 + $0x10] sm:$0xff]  ;;  %v814_v8 = vld [vmem:[#allocation12] sm:$0xff]  ;;  %v874_v9 = vld [vmem:[#allocation14 + $0x78] sm:$0xff] }
  0x4a   : > { %563 = vmatmul.f32.vlgmr.msra.gmra.mxu1 %v514_v7  ;;  %619 = vmatpush.msrb.mxu0 %v522_v16  ;;  %v815_v7 = vld [vmem:[#allocation12 + $0x8] sm:$0xff]  ;;  %v867_v16 = vld [vmem:[#allocation14 + $0x40] sm:$0xff]  ;;  %v861_v30 = vld [vmem:[#allocation14 + $0x10] sm:$0xff]  ;;  %s919_s21 = scalar_lea.hbm %s1798_s19, %s1117_s18  ;;  %s1398_s9 = scalar_lea.hbm %s1798_s19, 32 }
  0x4b   : > { %642 = vmatpush.msrb.mxu1 %v524_v18  ;;  %836 = vmatpush.msra.mxu2 %v827_v34  ;;  %v865_v18 = vld [vmem:[#allocation14 + $0x30] sm:$0xff]  ;;  %v859_v32 = vld [vmem:[#allocation14] sm:$0xff]  ;;  %s922_s27 = sshll.u32 %s919_s21, 4  ;;  %s923_s27 = int_to_ptr.hbm [resolvable:$true] %s922_s27 }
  0x4c   : > { %620 = vmatpush.msrb.mxu0 %v521_v17  ;;  %879 = vmatpush.msra.mxu3 %v874_v9  ;;  %v866_v17 = vld [vmem:[#allocation14 + $0x38] sm:$0xff]  ;;  %s1392_s23 = sshra.s32 %s923_s27, 4  ;;  %s1393_s23 = int_to_ptr.hbm [resolvable:$true] %s1392_s23 }
  0x4d   : > { %643 = vmatpush.msrb.mxu1 %v523_v19  ;;  %837 = vmatpush.msra.mxu2 %v826_v35  ;;  %v864_v19 = vld [vmem:[#allocation14 + $0x28] sm:$0xff]  ;;  %s1394_s7 = scalar_lea.hbm %s1393_s23, 16  ;;  %p1399_p8 = scmp.lt.s32.totalorder %s1393_s23, %s1798_s19 }
  0x4e   : > { %p1395_p1 = scmp.ne.s32.totalorder %s1393_s23, %s1394_s7  ;;  %p1400_p10 = scmp.lt.s32.totalorder %s1398_s9, %s1394_s7 }
  0x4f   : > { %838 = vmatpush.msra.mxu2 %v825_v38  ;;  %v1219_v38 = vld [vmem:[%s1797_s16] ss:$0 sm:$0xff] }
  0x50   : > { %p1396_p2 = pnand %p1395_p1, %p1607_p5  ;;  %p1401_p11 = por %p1400_p10, %p1399_p8 }
  0x51   : > { %839 = vmatpush.msra.mxu2 %v824_v39 }
  0x52   : > { %p1397_p4 = pneg %p1396_p2 }
  0x53   : > { %840 = vmatpush.msra.mxu2 %v823_v40 }
  0x54   : > { %p1402_p12 = pnand %p1401_p11, %p1397_p4 }
  0x55   : > { %841 = vmatpush.msra.mxu2 %v822_v41 }
  0x57   : > { %842 = vmatpush.msra.mxu2 %v821_v45 }
  0x59   : > { %843 = vmatpush.msra.mxu2 %v820_v47 }
  0x5b   : > { %844 = vmatpush.msra.mxu2 %v819_v51 }
  0x5d   : > { %845 = vmatpush.msra.mxu2 %v818_v53 }
  0x5f   : > { %846 = vmatpush.msra.mxu2 %v817_v58 }
  0x61   : > { %847 = vmatpush.msra.mxu2 %v816_v61 }
  0x63   : > { %848 = vmatpush.msra.mxu2 %v815_v7 }
  0x65   : > { %849 = vmatpush.msra.mxu2 %v814_v8 }
  0xc6   : > { %v544_v10 = vpop.f32.mrf.mxu0 }
  0xc7   : > { %v575_v11 = vsel %vm572_vm0, %v544_v10, -1e+30  ;;  %v564_v13 = vpop.f32.mrf.mxu1  ;;  %v873_v10 = vld [vmem:[#allocation14 + $0x70] sm:$0xff] }
  0xc8   : > { %v578_v12 = vsel %vm577_vm1, %v575_v11, -inf  ;;  %v576_v14 = vsel %vm572_vm0, %v564_v13, -1e+30  ;;  %880 = vmatpush.msra.mxu3 %v873_v10  ;;  %v870_v13 = vld [vmem:[#allocation14 + $0x58] sm:$0xff] }
  0xc9   : > { %579 = vmax.xlane.f32.xlu0 %v578_v12  ;;  %v581_v15 = vsel %vm577_vm1, %v576_v14, -inf  ;;  %v871_v12 = vld [vmem:[#allocation14 + $0x60] sm:$0xff] }
  0xd1   : > { %582 = vmax.xlane.f32.xlu0 %v581_v15  ;;  %v868_v15 = vld [vmem:[#allocation14 + $0x48] sm:$0xff] }
 0x13c   : > { %v580_v20 = vpop.xlane.xlu0 %579 }
 0x13d   : > { %v587_v21 = vsub.f32 %v575_v11, %v580_v20  ;;  %v872_v11 = vld [vmem:[#allocation14 + $0x68] sm:$0xff] }
 0x13e   : > { %881 = vmatpush.msra.mxu3 %v872_v11 }
 0x13f   : > { %v589_v22 = vmul.f32 1.442695, %v587_v21 }
 0x140   : > { %882 = vmatpush.msra.mxu3 %v871_v12 }
 0x141   : > { %1220 = vpow2.f32 %v589_v22 }
 0x142   : > { %883 = vmatpush.msra.mxu3 %v870_v13 }
 0x144   : > { %v583_v23 = vpop.xlane.xlu0 %582 }
 0x145   : > { %v588_v24 = vsub.f32 %v576_v14, %v583_v23  ;;  %v869_v14 = vld [vmem:[#allocation14 + $0x50] sm:$0xff]  ;;  %v863_v23 = vld [vmem:[#allocation14 + $0x20] sm:$0xff] }
 0x146   : > { %884 = vmatpush.msra.mxu3 %v869_v14 }
 0x147   : > { %v1221_v25 = vpop.eup %1220  ;;  %v591_v26 = vmul.f32 1.442695, %v588_v24 }
 0x148   : > { %1103 = vmatmul.msk.f32.vlgmr.msrb.gmra.mxu0 %vm577_vm1, %v1221_v25  ;;  %v593_v27 = vsel %vm577_vm1, %v1221_v25, 0.0  ;;  %885 = vmatpush.msra.mxu3 %v868_v15  ;;  %v862_v25 = vld [vmem:[#allocation14 + $0x18] sm:$0xff] }
 0x149   : > { %1222 = vpow2.f32 %v591_v26  ;;  %594 = vadd.xlane.f32.xlu1 %v593_v27 }
 0x14a   : > { %886 = vmatpush.msra.mxu3 %v867_v16 }
 0x14c   : > { %887 = vmatpush.msra.mxu3 %v866_v17 }
 0x14e   : > { %888 = vmatpush.msra.mxu3 %v865_v18 }
 0x14f   : > { %v1223_v28 = vpop.eup %1222 }
 0x150   : > { %1104 = vmatmul.msk.f32.vlgmr.msrb.gmra.mxu1 %vm577_vm1, %v1223_v28  ;;  %v596_v29 = vsel %vm577_vm1, %v1223_v28, 0.0  ;;  %889 = vmatpush.msra.mxu3 %v864_v19 }
 0x151   : > { %597 = vadd.xlane.f32.xlu1 %v596_v29 }
 0x152   : > { %890 = vmatpush.msra.mxu3 %v863_v23 }
 0x154   : > { %891 = vmatpush.msra.mxu3 %v862_v25 }
 0x156   : > { %892 = vmatpush.msra.mxu3 %v861_v30 }
 0x1bc   : > { %v595_v31 = vpop.xlane.xlu1 %594 }
 0x1bd   : > { %600 = vst.msk [vmem:[#allocation4] sm:$0xff] %vm599_vm2, %v595_v31  ;;  %v860_v31 = vld [vmem:[#allocation14 + $0x8] sm:$0xff] }
 0x1be   : > { %893 = vmatpush.msra.mxu3 %v860_v31 }
 0x1c0   : > { %894 = vmatpush.msra.mxu3 %v859_v32 }
 0x1c4   : > { %v598_v36 = vpop.xlane.xlu1 %597  ;;  %v766_v37 = vld [vmem:[#allocation4] sm:$0xff] }
 0x1c5   : > { %601 = vst.msk [vmem:[#allocation4 + $0x8] sm:$0xff] %vm599_vm2, %v598_v36  ;;  %1224 = vrcp.f32 %v766_v37  ;;  %v779_v48 = vand.u32 2147483648, %v766_v37  ;;  %v777_v50 = vand.u32 2147483647, %v766_v37  ;;  %vm773_vm4 = vweird.f32 %v766_v37  ;;  %v622_v20 = vpop.f32.mrf.mxu0 }
 0x1c7   : > { %v780_v55 = vor.u32 1.1754944e-38, %v779_v48  ;;  %vm778_vm6 = vcmp.eq.f32.partialorder %v777_v50, 8.507059e+37 }
 0x1cb   : > { %v1225_v42 = vpop.eup %1224 }
 0x1cc   : > { %v769_v43 = vmul.f32 %v1225_v42, %v766_v37  ;;  %v767_v44 = vld [vmem:[#allocation4 + $0x8] sm:$0xff]  ;;  %vm774_vm3 = vweird.f32 %v1225_v42 }
 0x1cd   : > { %1226 = vrcp.f32 %v767_v44  ;;  %vm775_vm5 = vmor %vm773_vm4, %vm774_vm3  ;;  %v793_v62 = vand.u32 2147483648, %v767_v44  ;;  %v791_v0 = vand.u32 2147483647, %v767_v44  ;;  %vm787_vm8 = vweird.f32 %v767_v44  ;;  %v645_v26 = vpop.f32.mrf.mxu1 }
 0x1ce   : > { %v770_v46 = vsub.f32 1.0, %v769_v43 }
 0x1cf   : > { %v794_v3 = vor.u32 1.1754944e-38, %v793_v62  ;;  %vm792_vm10 = vcmp.eq.f32.partialorder %v791_v0, 8.507059e+37 }
 0x1d0   : > { %v771_v49 = vmul.f32 %v1225_v42, %v770_v46 }
 0x1d2   : > { %v772_v52 = vadd.f32 %v1225_v42, %v771_v49 }
 0x1d3   : > { %v1227_v54 = vpop.eup %1226 }
 0x1d4   : > { %v776_v56 = vsel %vm775_vm5, %v1225_v42, %v772_v52  ;;  %v783_v57 = vmul.f32 %v1227_v54, %v767_v44  ;;  %vm788_vm7 = vweird.f32 %v1227_v54 }
 0x1d5   : > { %v781_v59 = vsel %vm778_vm6, %v780_v55, %v776_v56  ;;  %vm789_vm9 = vmor %vm787_vm8, %vm788_vm7 }
 0x1d6   : > { %802 = vperm.xlu2 %1216, %v781_v59   ;;  %v784_v60 = vsub.f32 1.0, %v783_v57 }
 0x1d8   : > { %v785_v63 = vmul.f32 %v1227_v54, %v784_v60 }
 0x1da   : > { %v786_v1 = vadd.f32 %v1227_v54, %v785_v63 }
 0x1dc   : > { %v790_v5 = vsel %vm789_vm9, %v1227_v54, %v786_v1 }
 0x1dd   : > { %v795_v6 = vsel %vm792_vm10, %v794_v3, %v790_v5 }
 0x1de   : > { %807 = vperm.xlu2 %1216, %v795_v6  }
 0x230   : > { %v803_v21 = vpop.permute.xlu2 %802 }
 0x231   : > { %v810_v22 = vmul.f32 %v803_v21, %v622_v20 }
 0x233   : > { %v812_v24 = vadd.f32 %v810_v22, %v1687_v2  ;;  %v1218_v2 = vld [vmem:[%s1757_s4] ss:$0 sm:$0xff] }
 0x235   : > { %850 = vmatmul.f32.vlgmr.msra.gmra.mxu2 %v812_v24 }
 0x238   : > { %v808_v27 = vpop.permute.xlu2 %807 }
 0x239   : > { %v811_v28 = vmul.f32 %v808_v27, %v645_v26 }
 0x23b   : > { %v813_v29 = vadd.f32 %v811_v28, %v1689_v4 }
 0x23d   : > { %853 = vmatmul.f32.gmra.mxu2 %v813_v29 }
 0x2b8   : > { %v851_v33 = vpop.f32.mrf.mxu2 }
 0x2b9   : > { %v852_v34 = vadd.f32 %v1218_v2, %v851_v33 }
 0x2bb   : > { %v857_v35 = vmax.f32 %v852_v34, 0.0 }
 0x2bd   : > { %895 = vmatmul.f32.vlgmr.msra.gmra.mxu3 %v857_v35 }
 0x2c0   : > { %v854_v36 = vpop.f32.mrf.mxu2 }
 0x2c1   : > { %v855_v37 = vadd.f32 %v1218_v2, %v854_v36 }
 0x2c3   : > { %v858_v4 = vmax.f32 %v855_v37, 0.0 }
 0x2c5   : > { %898 = vmatmul.f32.gmra.mxu3 %v858_v4 }
 0x340   : > { %v896_v39 = vpop.f32.mrf.mxu3 }
 0x341   : > { %v897_v40 = vadd.f32 %v1219_v38, %v896_v39 }
 0x343   : > { %v902_v41 = vadd.f32 %v897_v40, %v812_v24 }
 0x345   : > { %904 = vst [vmem:[%s500_s29] sm:$0xff] %v902_v41 }
 0x348   : > { %v899_v42 = vpop.f32.mrf.mxu3 }
 0x349   : > { %v900_v43 = vadd.f32 %v1219_v38, %v899_v42 }
 0x34b   : > { %v903_v44 = vadd.f32 %v900_v43, %v813_v29 }
 0x34d   : > { %905 = vst [vmem:[%s500_s29 + $0x8] sm:$0xff] %v903_v44 }
 0x34e   : > { %1405 = shalt.err (!%p1402_p12)
}
 0x34f   : > { %s1475_s6 = smov 128   ;;  %s1476_s28 = smov 8  }
 0x350   : > { %1132 = dma.vmem_to_hbm [thread:$0]  (%p1607_p5), %s921_s1, 256, %s923_s27, %s907_s25, %s1475_s6, %s1475_s6, %s1476_s28  }
 0x351 PF: > { %s1800_s17 = sld [smem:[#allocation20_spill]] }
 0x352   : > { %s1802_s15 = sld [smem:[#allocation22_spill]] }
 0x357   : > { %s937_s24 = sand.u32 1, %s1800_s17  }
 0x358   : > { %p1803_p13 = scmp.ge.s32.totalorder %s1802_s15, 2  ;;  %s938_s3 = scalar_lea.sflag [#allocation8], %s937_s24 }
 0x35a   : > { %p1152_p0 = pnand %p1803_p13, %p1572_p6 }
 0x35c   : > { %p1153_p3 = pneg %p1152_p0 }
 0x35e   : > { %1443 = dma.done.wait (%p1153_p3), %s938_s3, 256  }
 0x35f   : > { %1445 = vsyncadd (%p1153_p3), %s938_s3, 4294967040  ;;  %s29_s8 = sadd.s32 1, %s1802_s15   ;;  %s1804_s16 = sld [smem:[#allocation21_spill]] }
 0x360   : > { %p26_p7 = scmp.ge.s32.totalorder %s29_s8, 4   ;;  %s1805_s11 = sld [smem:[#allocation26_spill]] }
 0x361   : > { %s1806_s18 = sld [smem:[#allocation24_spill]]  ;;  %s1807_s30 = smov %s1452_s10 }
 0x362   : > { %s1809_s7 = smov %s1464_s12 }
 0x363   :  { %28 = sbr.rel (!%p26_p7) target bundleno = 14 (0xe), region = 149 }
 0x365   : > { %s1808_s10 = smov %s1804_s16 }
 0x367   : > { %s1810_s12 = smov %s1806_s18 }
 0x368   :  { %944 = vsyncpa [#allocation7], 1 }
 0x369   :  { %946 = vsyncpa [#allocation7 + $0x1], 1 }
 0x36a   :  { %947 = vsyncpa [#allocation10], 1 }
 0x36b   :  { %949 = vsyncpa [#allocation10 + $0x1], 1 }
 0x36c   :  { %950 = vsyncpa [#allocation13], 1 }
 0x36d   :  { %951 = vsyncpa [#allocation8], 1 }
 0x36e   :  { %953 = vsyncpa [#allocation8 + $0x1], 1 }

</bundles_post_ra>
